<compile_context>
chip_gen: v7x
topology: tpu7x:2x2x1
jax: 0.10.0
libtpu: 0.0.40
codegen_flags: <defaults>
</compile_context>

<pallas_src>
import functools

import jax
import jax.numpy as jnp
from jax import lax
from jax.experimental import pallas as pl
from jax.experimental.pallas import tpu as pltpu


# ----------------------------------------------------------------------------
# Pallas kernel
# ----------------------------------------------------------------------------
def _lstm_forecaster_kernel(n_layers, *refs):
    if n_layers > 1:
        (x_ref,          # (T, Btile)           time-major input (input_size==1 squeezed)
         w_ih0_ref,      # (1, 4H)              layer-0 W_ih^T, gate order (i,f,o,g)
         w_ih_rest_ref,  # (L-1, H, 4H)         W_ih^T for layers >= 1
         w_hh_ref,       # (L, H, 4H)           W_hh^T per layer
         b_ref,          # (L, 1, 4H)           b_ih + b_hh per layer
         w_lin_ref,      # (1, H)               linear head weight row
         b_lin_ref,      # (1, 1)               linear head bias
         out_ref,        # (T, Btile)           time-major output
         xg_seq,         # VMEM (T, Btile, 4H)  precomputed input gates + bias
         h_seq,          # VMEM (T, Btile, H)   hidden sequence of current layer
         ) = refs
    else:
        (x_ref, w_ih0_ref, w_hh_ref, b_ref, w_lin_ref, b_lin_ref,
         out_ref, xg_seq, h_seq) = refs
        w_ih_rest_ref = None

    T, B = x_ref.shape
    L, H, H4 = w_hh_ref.shape
    H2 = 2 * H
    H3 = 3 * H

    # Hoisted once (not per step): lane mask selecting the sigmoid (i,f,o) slab
    # vs the tanh (g) slab, already broadcast to the full (B, 4H) tile.
    ifo_mask = lax.broadcasted_iota(jnp.int32, (B, H4), 1) < H3

    # Full unroll only for short sequences; partial unroll for long T keeps
    # vreg live ranges bounded while preserving LLO scheduling visibility.
    unroll = True if T <= 16 else 8

    def run_layer(w_hh_l_ref):
        # xg_seq already holds  x_proj + (b_ih + b_hh)  for every timestep.
        h0 = jnp.zeros((B, H), jnp.float32)
        c0 = jnp.zeros((B, H), jnp.float32)

        def step(t, carry):
            h, c = carry
            # W_hh streamed from VMEM into the MXU (ref view, loaded at the dot).
            gates = xg_seq[t] + jnp.dot(h, w_hh_l_ref[...],
                                        preferred_element_type=jnp.float32)
            # Full-width activations + one select (no masked/misaligned EUP pushes).
            act = jnp.where(ifo_mask, jax.nn.sigmoid(gates), jnp.tanh(gates))
            i = act[:, :H]
            f = act[:, H:H2]
            o = act[:, H2:H3]
            g = act[:, H3:]
            c_new = f * c + i * g
            h_new = o * jnp.tanh(c_new)
            h_seq[t] = h_new
            return (h_new, c_new)

        lax.fori_loop(0, T, step, (h0, c0), unroll=unroll)

    # ---- layer 0 (input_size == 1): x * W_ih0 + b0 for all timesteps at once ----
    xg_seq[...] = (x_ref[...][:, :, None] * w_ih0_ref[...][None, :, :]
                   + b_ref[0][None, :, :])                        # (T, B, 4H)
    run_layer(w_hh_ref.at[0])

    # ---- layers 1 .. L-1: hoisted input projection as one flat MXU matmul ----
    for l in range(1, L):
        h_flat = h_seq[...].reshape(T * B, H)                     # (T*B, H)
        xg = jnp.dot(h_flat, w_ih_rest_ref[l - 1],
                     preferred_element_type=jnp.float32)          # (T*B, 4H)
        xg_seq[...] = xg.reshape(T, B, H4) + b_ref[l][None, :, :]
        run_layer(w_hh_ref.at[l])

    # ---- linear head (H -> 1): VPU multiply + lane reduction ----
    w_row = w_lin_ref[...]                                        # (1, H)
    y = jnp.sum(h_seq[...] * w_row[None, :, :], axis=-1)          # (T, B)
    out_ref[...] = y + b_lin_ref[0, 0]


# ----------------------------------------------------------------------------
# VMEM budgeting helpers (static, trace-time Python ints)
# ----------------------------------------------------------------------------
def _round_up(v, m):
    return ((v + m - 1) // m) * m


def _tile_bytes(shape, itemsize=4):
    shape = list(shape)
    if len(shape) == 1:
        shape = [1] + shape
    shape[-1] = _round_up(shape[-1], 128)   # lane padding
    shape[-2] = _round_up(shape[-2], 8)     # sublane padding
    n = 1
    for s in shape:
        n *= s
    return n * itemsize


def _vmem_limit_bytes(T, Btile, H, L, has_rest):
    H4 = 4 * H
    est = 0
    # BlockSpec-pipelined operands / outputs are double-buffered.
    est += 2 * _tile_bytes((T, Btile))              # x tile
    est += 2 * _tile_bytes((1, H4))                 # w_ih0
    if has_rest:
        est += 2 * _tile_bytes((L - 1, H, H4))      # w_ih_rest
    est += 2 * _tile_bytes((L, H, H4))              # w_hh
    est += 2 * _tile_bytes((L, 1, H4))              # fused biases
    est += 2 * _tile_bytes((1, H))                  # w_lin
    est += 2 * _tile_bytes((1, 1))                  # b_lin
    est += 2 * _tile_bytes((T, Btile))              # out tile
    # Scratch (single-buffered, persists across the batch grid).
    est += _tile_bytes((T, Btile, H4))              # xg_seq
    est += _tile_bytes((T, Btile, H))               # h_seq
    # 25% + 2 MiB margin for compiler-internal scratch; cap at v7x's 64 MiB.
    return int(min(64 * 2**20, max(8 * 2**20, est * 5 // 4 + 2 * 2**20)))


# ----------------------------------------------------------------------------
# Wrapper
# ----------------------------------------------------------------------------
@functools.partial(jax.jit,
                   static_argnames=("hidden_size", "n_layers", "batch_tile"))
def forecaster_forward(x, params, *, hidden_size, n_layers, batch_tile=None):
    """x: (B, T, 1) float32, like the PyTorch batch_first LSTM input."""
    B, T, in_dim = x.shape
    assert in_dim == 1
    H = hidden_size
    L = n_layers
    H4 = 4 * H

    # Batch tile: multiple of 8 sublanes; 128 for large batches so the output
    # rows are lane-dense (unmasked vst) and both v7x cores get >= 1 tile.
    if batch_tile is None:
        batch_tile = 128 if B >= 128 else max(8, _round_up(B, 8))
    Btile = batch_tile
    Bp = _round_up(max(B, 1), Btile)
    nb = Bp // Btile

    x_tm = jnp.transpose(x[:, :, 0]).astype(jnp.float32)                # (T, B)
    if Bp != B:
        x_tm = jnp.pad(x_tm, ((0, 0), (0, Bp - B)))                     # (T, Bp)

    w_ih0 = params["w_ih0"]          # (1, 4H)
    w_ih_rest = params["w_ih_rest"]  # (L-1, H, 4H) or None when L == 1
    w_hh = params["w_hh"]            # (L, H, 4H)
    b = params["b"]                  # (L, 1, 4H)
    w_lin = params["w_lin"]          # (1, H)
    b_lin = params["b_lin"]          # (1, 1)

    has_rest = L > 1

    operands = [x_tm, w_ih0]
    in_specs = [
        pl.BlockSpec((T, Btile), lambda i: (0, i)),
        pl.BlockSpec((1, H4), lambda i: (0, 0)),
    ]
    if has_rest:
        operands.append(w_ih_rest)
        in_specs.append(pl.BlockSpec((L - 1, H, H4), lambda i: (0, 0, 0)))
    operands += [w_hh, b, w_lin, b_lin]
    in_specs += [
        pl.BlockSpec((L, H, H4), lambda i: (0, 0, 0)),
        pl.BlockSpec((L, 1, H4), lambda i: (0, 0, 0)),
        pl.BlockSpec((1, H), lambda i: (0, 0)),
        pl.BlockSpec((1, 1), lambda i: (0, 0)),
    ]

    out_tb = pl.pallas_call(
        functools.partial(_lstm_forecaster_kernel, L),
        out_shape=jax.ShapeDtypeStruct((T, Bp), jnp.float32),
        grid=(nb,),
        in_specs=in_specs,
        out_specs=pl.BlockSpec((T, Btile), lambda i: (0, i)),
        scratch_shapes=[
            pltpu.VMEM((T, Btile, H4), jnp.float32),   # xg_seq (input gates + bias)
            pltpu.VMEM((T, Btile, H), jnp.float32),    # h_seq
        ],
        compiler_params=pltpu.CompilerParams(
            dimension_semantics=("parallel",),
            vmem_limit_bytes=_vmem_limit_bytes(T, Btile, H, L, has_rest)),
    )(*operands)

    # Time-major -> batch-major, drop batch padding (layout plumbing in XLA).
    return jnp.transpose(out_tb)[:B]                                    # (B, T)


# ----------------------------------------------------------------------------
# Deterministic parameter construction (synthetic; matches nn.LSTM/Linear shapes)
# ----------------------------------------------------------------------------
def _perm_gates(w):
    """PyTorch gate order (i, f, g, o) -> kernel gate order (i, f, o, g) along axis 0."""
    H = w.shape[0] // 4
    return jnp.concatenate([w[:H], w[H:2 * H], w[3 * H:4 * H], w[2 * H:3 * H]],
                           axis=0)


def init_params(key, hidden_size, n_layers):
    H = hidden_size
    L = n_layers
    H4 = 4 * H
    scale = 1.0 / jnp.sqrt(H)

    keys = jax.random.split(key, 4 * L + 2)
    layers = []
    for l in range(L):
        in_sz = 1 if l == 0 else H
        w_ih = jax.random.uniform(keys[4 * l + 0], (H4, in_sz), jnp.float32,
                                  -scale, scale)
        w_hh = jax.random.uniform(keys[4 * l + 1], (H4, H), jnp.float32,
                                  -scale, scale)
        b_ih = jax.random.uniform(keys[4 * l + 2], (H4,), jnp.float32,
                                  -scale, scale)
        b_hh = jax.random.uniform(keys[4 * l + 3], (H4,), jnp.float32,
                                  -scale, scale)
        layers.append((w_ih, w_hh, b_ih, b_hh))
    w_lin = jax.random.uniform(keys[-2], (1, H), jnp.float32, -scale, scale)
    b_lin = jax.random.uniform(keys[-1], (1,), jnp.float32, -scale, scale)

    # Repack for the kernel: gate-permuted, pre-transposed, stacked, biases fused.
    w_ih0 = _perm_gates(layers[0][0]).T                               # (1, 4H)
    if L > 1:
        w_ih_rest = jnp.stack(
            [_perm_gates(layers[l][0]).T for l in range(1, L)])       # (L-1, H, 4H)
    else:
        w_ih_rest = None                                              # not passed at all
    w_hh = jnp.stack([_perm_gates(layers[l][1]).T for l in range(L)])  # (L, H, 4H)
    b = jnp.stack([_perm_gates(layers[l][2] + layers[l][3])[None, :]
                   for l in range(L)])                                # (L, 1, 4H)
    kernel_params = {
        "w_ih0": w_ih0,
        "w_ih_rest": w_ih_rest,
        "w_hh": w_hh,
        "b": b,
        "w_lin": w_lin,                                               # (1, H)
        "b_lin": b_lin.reshape(1, 1),                                 # (1, 1)
    }
    return kernel_params, layers, w_lin, b_lin


# ----------------------------------------------------------------------------
# Pure-JAX reference (mirrors PyTorch nn.LSTM + nn.Linear + Flatten semantics)
# ----------------------------------------------------------------------------
def forecaster_ref(x, layers, w_lin, b_lin, hidden_size):
    B, T, _ = x.shape
    H = hidden_size
    inp = x.astype(jnp.float32)                                  # (B, T, in)
    for (w_ih, w_hh, b_ih, b_hh) in layers:
        def step(carry, x_t):
            h, c = carry
            gates = x_t @ w_ih.T + h @ w_hh.T + b_ih + b_hh
            i, f, g, o = jnp.split(gates, 4, axis=-1)
            i = jax.nn.sigmoid(i)
            f = jax.nn.sigmoid(f)
            g = jnp.tanh(g)
            o = jax.nn.sigmoid(o)
            c = f * c + i * g
            h = o * jnp.tanh(c)
            return (h, c), h
        h0 = jnp.zeros((B, H), jnp.float32)
        c0 = jnp.zeros((B, H), jnp.float32)
        _, hs = lax.scan(step, (h0, c0), jnp.transpose(inp, (1, 0, 2)))
        inp = jnp.transpose(hs, (1, 0, 2))                       # (B, T, H)
    y = inp @ w_lin.T + b_lin                                    # (B, T, 1)
    return y[:, :, 0]                                            # flatten(-2)


if __name__ == "__main__":
    B, T = 2, 8
    hidden_size, n_layers = 32, 2   # model_type='LSTM'

    key = jax.random.PRNGKey(0)
    k_param, k_x = jax.random.split(key)
    params, layers, w_lin, b_lin = init_params(k_param, hidden_size, n_layers)

    x = jax.random.normal(k_x, (B, T, 1), jnp.float32)           # (B, T, 1)

    out = forecaster_forward(x, params, hidden_size=hidden_size,
                             n_layers=n_layers)
    out = jax.block_until_ready(out)

    ref = forecaster_ref(x, layers, w_lin, b_lin, hidden_size)
    assert out.shape == (B, T), out.shape
    assert jnp.allclose(out, ref, atol=1e-4, rtol=1e-4), (out, ref)

    print("KERNEL_OK")
</pallas_src>

<mosaic_0001>
module attributes {stable_mosaic.version = 11 : i64} {
  func.func @_lstm_forecaster_kernel(%arg0: i32, %arg1: memref<8x8xf32, #tpu.memory_space<vmem>>, %arg2: memref<1x128xf32, #tpu.memory_space<vmem>>, %arg3: memref<1x32x128xf32, #tpu.memory_space<vmem>>, %arg4: memref<2x32x128xf32, #tpu.memory_space<vmem>>, %arg5: memref<2x1x128xf32, #tpu.memory_space<vmem>>, %arg6: memref<1x32xf32, #tpu.memory_space<vmem>>, %arg7: memref<1x1xf32, #tpu.memory_space<vmem>>, %arg8: memref<8x8xf32, #tpu.memory_space<vmem>>, %arg9: memref<8x8x128xf32, #tpu.memory_space<vmem>>, %arg10: memref<8x8x32xf32, #tpu.memory_space<vmem>>) attributes {dimension_semantics = [#tpu.dimension_semantics<parallel>], iteration_bounds = array<i64: 1>, scalar_prefetch = 0 : i64, scratch_operands = 2 : i64, tpu.core_type = #tpu.core_type<tc>, window_params = [{transform_indices = @transform_0, window_bounds = array<i64: 8, 8>}, {pipeline_mode = #tpu.pipeline_mode<synchronous>, transform_indices = @transform_1, window_bounds = array<i64: 1, 128>}, {pipeline_mode = #tpu.pipeline_mode<synchronous>, transform_indices = @transform_2, window_bounds = array<i64: 1, 32, 128>}, {pipeline_mode = #tpu.pipeline_mode<synchronous>, transform_indices = @transform_3, window_bounds = array<i64: 2, 32, 128>}, {pipeline_mode = #tpu.pipeline_mode<synchronous>, transform_indices = @transform_4, window_bounds = array<i64: 2, 1, 128>}, {pipeline_mode = #tpu.pipeline_mode<synchronous>, transform_indices = @transform_5, window_bounds = array<i64: 1, 32>}, {pipeline_mode = #tpu.pipeline_mode<synchronous>, transform_indices = @transform_6, window_bounds = array<i64: 1, 1>}, {transform_indices = @transform_7, window_bounds = array<i64: 8, 8>}]} {
    %0 = tpu.iota {dimensions = array<i32: 1>} : vector<8x128xi32>
    %c96_i32 = arith.constant 96 : i32
    %1 = vector.broadcast %c96_i32 : i32 to vector<8x128xi32>
    %2 = arith.cmpi slt, %0, %1 : vector<8x128xi32>
    %c0 = arith.constant 0 : index
    %c0_0 = arith.constant 0 : index
    %3 = vector.load %arg1[%c0, %c0_0] : memref<8x8xf32, #tpu.memory_space<vmem>>, vector<8x8xf32>
    %4 = vector.shape_cast %3 : vector<8x8xf32> to vector<8x8x1xf32>
    %c0_1 = arith.constant 0 : index
    %c0_2 = arith.constant 0 : index
    %5 = vector.load %arg2[%c0_1, %c0_2] : memref<1x128xf32, #tpu.memory_space<vmem>>, vector<1x128xf32>
    %6 = vector.shape_cast %5 : vector<1x128xf32> to vector<1x1x128xf32>
    %7 = vector.broadcast %4 : vector<8x8x1xf32> to vector<8x8x128xf32>
    %8 = vector.broadcast %6 : vector<1x1x128xf32> to vector<8x8x128xf32>
    %9 = arith.mulf %7, %8 : vector<8x8x128xf32>
    %c0_3 = arith.constant 0 : index
    %c0_4 = arith.constant 0 : index
    %c0_5 = arith.constant 0 : index
    %10 = vector.load %arg5[%c0_3, %c0_4, %c0_5] : memref<2x1x128xf32, #tpu.memory_space<vmem>>, vector<1x1x128xf32>
    %11 = vector.shape_cast %10 : vector<1x1x128xf32> to vector<1x128xf32>
    %12 = vector.shape_cast %11 : vector<1x128xf32> to vector<1x1x128xf32>
    %13 = vector.broadcast %12 : vector<1x1x128xf32> to vector<8x8x128xf32>
    %14 = arith.addf %9, %13 : vector<8x8x128xf32>
    %c0_6 = arith.constant 0 : index
    %c0_7 = arith.constant 0 : index
    %c0_8 = arith.constant 0 : index
    %15 = vector.load %arg9[%c0_6, %c0_7, %c0_8] : memref<8x8x128xf32, #tpu.memory_space<vmem>>, vector<8x8x128xf32>
    tpu.vector_store %arg9[%c0_6, %c0_7, %c0_8], %14 {strides = array<i32>} : memref<8x8x128xf32, #tpu.memory_space<vmem>>, vector<8x8x128xf32>,
    %cst = arith.constant 0.000000e+00 : f32
    %16 = vector.broadcast %cst : f32 to vector<8x32xf32>
    %cst_9 = arith.constant 0.000000e+00 : f32
    %17 = vector.broadcast %cst_9 : f32 to vector<8x32xf32>
    %c0_i32 = arith.constant 0 : i32
    %c0_i32_10 = arith.constant 0 : i32
    %18 = arith.index_cast %c0_i32_10 : i32 to index
    %c0_11 = arith.constant 0 : index
    %c0_12 = arith.constant 0 : index
    %19 = vector.load %arg9[%18, %c0_11, %c0_12] : memref<8x8x128xf32, #tpu.memory_space<vmem>>, vector<1x8x128xf32>
    %20 = vector.shape_cast %19 : vector<1x8x128xf32> to vector<8x128xf32>
    %21 = arith.index_cast %c0_i32 : i32 to index
    %c0_13 = arith.constant 0 : index
    %c0_14 = arith.constant 0 : index
    %22 = vector.load %arg4[%21, %c0_13, %c0_14] : memref<2x32x128xf32, #tpu.memory_space<vmem>>, vector<1x32x128xf32>
    %23 = vector.shape_cast %22 : vector<1x32x128xf32> to vector<32x128xf32>
    %cst_15 = arith.constant dense<0.000000e+00> : vector<8x128xf32>
    %24 = tpu.matmul %16, %23, %cst_15 {dimension_numbers = #tpu.dot_dimension_numbers<[1], [0], [0], [1], [0, 0, 1, 1], [], []>} : vector<8x32xf32>, vector<32x128xf32>, vector<8x128xf32> -> vector<8x128xf32>
    %25 = arith.addf %20, %24 : vector<8x128xf32>
    %26 = arith.negf %25 : vector<8x128xf32>
    %27 = math.exp %26 : vector<8x128xf32>
    %cst_16 = arith.constant 1.000000e+00 : f32
    %28 = vector.broadcast %cst_16 : f32 to vector<8x128xf32>
    %29 = arith.addf %28, %27 : vector<8x128xf32>
    %30 = arith.divf %28, %29 : vector<8x128xf32>
    %31 = math.tanh %25 : vector<8x128xf32>
    %32 = arith.select %2, %30, %31 : vector<8x128xi1>, vector<8x128xf32>
    %33 = vector.extract_strided_slice %32 {offsets = [0, 0], sizes = [8, 32], strides = [1, 1]} : vector<8x128xf32> to vector<8x32xf32>
    %34 = vector.extract_strided_slice %32 {offsets = [0, 32], sizes = [8, 32], strides = [1, 1]} : vector<8x128xf32> to vector<8x32xf32>
    %35 = vector.extract_strided_slice %32 {offsets = [0, 64], sizes = [8, 32], strides = [1, 1]} : vector<8x128xf32> to vector<8x32xf32>
    %36 = vector.extract_strided_slice %32 {offsets = [0, 96], sizes = [8, 32], strides = [1, 1]} : vector<8x128xf32> to vector<8x32xf32>
    %37 = arith.mulf %34, %17 : vector<8x32xf32>
    %38 = arith.mulf %33, %36 : vector<8x32xf32>
    %39 = arith.addf %37, %38 : vector<8x32xf32>
    %40 = math.tanh %39 : vector<8x32xf32>
    %41 = arith.mulf %35, %40 : vector<8x32xf32>
    %42 = arith.index_cast %c0_i32_10 : i32 to index
    %c0_17 = arith.constant 0 : index
    %c0_18 = arith.constant 0 : index
    %43 = vector.load %arg10[%42, %c0_17, %c0_18] : memref<8x8x32xf32, #tpu.memory_space<vmem>>, vector<1x8x32xf32>
    %44 = vector.shape_cast %43 : vector<1x8x32xf32> to vector<8x32xf32>
    %45 = vector.shape_cast %41 : vector<8x32xf32> to vector<1x8x32xf32>
    tpu.vector_store %arg10[%42, %c0_17, %c0_18], %45 {strides = array<i32>} : memref<8x8x32xf32, #tpu.memory_space<vmem>>, vector<1x8x32xf32>,
    %c1_i32 = arith.constant 1 : i32
    %46 = arith.index_cast %c1_i32 : i32 to index
    %c0_19 = arith.constant 0 : index
    %c0_20 = arith.constant 0 : index
    %47 = vector.load %arg9[%46, %c0_19, %c0_20] : memref<8x8x128xf32, #tpu.memory_space<vmem>>, vector<1x8x128xf32>
    %48 = vector.shape_cast %47 : vector<1x8x128xf32> to vector<8x128xf32>
    %49 = arith.index_cast %c0_i32 : i32 to index
    %c0_21 = arith.constant 0 : index
    %c0_22 = arith.constant 0 : index
    %50 = vector.load %arg4[%49, %c0_21, %c0_22] : memref<2x32x128xf32, #tpu.memory_space<vmem>>, vector<1x32x128xf32>
    %51 = vector.shape_cast %50 : vector<1x32x128xf32> to vector<32x128xf32>
    %cst_23 = arith.constant dense<0.000000e+00> : vector<8x128xf32>
    %52 = tpu.matmul %41, %51, %cst_23 {dimension_numbers = #tpu.dot_dimension_numbers<[1], [0], [0], [1], [0, 0, 1, 1], [], []>} : vector<8x32xf32>, vector<32x128xf32>, vector<8x128xf32> -> vector<8x128xf32>
    %53 = arith.addf %48, %52 : vector<8x128xf32>
    %54 = arith.negf %53 : vector<8x128xf32>
    %55 = math.exp %54 : vector<8x128xf32>
    %cst_24 = arith.constant 1.000000e+00 : f32
    %56 = vector.broadcast %cst_24 : f32 to vector<8x128xf32>
    %57 = arith.addf %56, %55 : vector<8x128xf32>
    %58 = arith.divf %56, %57 : vector<8x128xf32>
    %59 = math.tanh %53 : vector<8x128xf32>
    %60 = arith.select %2, %58, %59 : vector<8x128xi1>, vector<8x128xf32>
    %61 = vector.extract_strided_slice %60 {offsets = [0, 0], sizes = [8, 32], strides = [1, 1]} : vector<8x128xf32> to vector<8x32xf32>
    %62 = vector.extract_strided_slice %60 {offsets = [0, 32], sizes = [8, 32], strides = [1, 1]} : vector<8x128xf32> to vector<8x32xf32>
    %63 = vector.extract_strided_slice %60 {offsets = [0, 64], sizes = [8, 32], strides = [1, 1]} : vector<8x128xf32> to vector<8x32xf32>
    %64 = vector.extract_strided_slice %60 {offsets = [0, 96], sizes = [8, 32], strides = [1, 1]} : vector<8x128xf32> to vector<8x32xf32>
    %65 = arith.mulf %62, %39 : vector<8x32xf32>
    %66 = arith.mulf %61, %64 : vector<8x32xf32>
    %67 = arith.addf %65, %66 : vector<8x32xf32>
    %68 = math.tanh %67 : vector<8x32xf32>
    %69 = arith.mulf %63, %68 : vector<8x32xf32>
    %70 = arith.index_cast %c1_i32 : i32 to index
    %c0_25 = arith.constant 0 : index
    %c0_26 = arith.constant 0 : index
    %71 = vector.load %arg10[%70, %c0_25, %c0_26] : memref<8x8x32xf32, #tpu.memory_space<vmem>>, vector<1x8x32xf32>
    %72 = vector.shape_cast %71 : vector<1x8x32xf32> to vector<8x32xf32>
    %73 = vector.shape_cast %69 : vector<8x32xf32> to vector<1x8x32xf32>
    tpu.vector_store %arg10[%70, %c0_25, %c0_26], %73 {strides = array<i32>} : memref<8x8x32xf32, #tpu.memory_space<vmem>>, vector<1x8x32xf32>,
    %c2_i32 = arith.constant 2 : i32
    %74 = arith.index_cast %c2_i32 : i32 to index
    %c0_27 = arith.constant 0 : index
    %c0_28 = arith.constant 0 : index
    %75 = vector.load %arg9[%74, %c0_27, %c0_28] : memref<8x8x128xf32, #tpu.memory_space<vmem>>, vector<1x8x128xf32>
    %76 = vector.shape_cast %75 : vector<1x8x128xf32> to vector<8x128xf32>
    %77 = arith.index_cast %c0_i32 : i32 to index
    %c0_29 = arith.constant 0 : index
    %c0_30 = arith.constant 0 : index
    %78 = vector.load %arg4[%77, %c0_29, %c0_30] : memref<2x32x128xf32, #tpu.memory_space<vmem>>, vector<1x32x128xf32>
    %79 = vector.shape_cast %78 : vector<1x32x128xf32> to vector<32x128xf32>
    %cst_31 = arith.constant dense<0.000000e+00> : vector<8x128xf32>
    %80 = tpu.matmul %69, %79, %cst_31 {dimension_numbers = #tpu.dot_dimension_numbers<[1], [0], [0], [1], [0, 0, 1, 1], [], []>} : vector<8x32xf32>, vector<32x128xf32>, vector<8x128xf32> -> vector<8x128xf32>
    %81 = arith.addf %76, %80 : vector<8x128xf32>
    %82 = arith.negf %81 : vector<8x128xf32>
    %83 = math.exp %82 : vector<8x128xf32>
    %cst_32 = arith.constant 1.000000e+00 : f32
    %84 = vector.broadcast %cst_32 : f32 to vector<8x128xf32>
    %85 = arith.addf %84, %83 : vector<8x128xf32>
    %86 = arith.divf %84, %85 : vector<8x128xf32>
    %87 = math.tanh %81 : vector<8x128xf32>
    %88 = arith.select %2, %86, %87 : vector<8x128xi1>, vector<8x128xf32>
    %89 = vector.extract_strided_slice %88 {offsets = [0, 0], sizes = [8, 32], strides = [1, 1]} : vector<8x128xf32> to vector<8x32xf32>
    %90 = vector.extract_strided_slice %88 {offsets = [0, 32], sizes = [8, 32], strides = [1, 1]} : vector<8x128xf32> to vector<8x32xf32>
    %91 = vector.extract_strided_slice %88 {offsets = [0, 64], sizes = [8, 32], strides = [1, 1]} : vector<8x128xf32> to vector<8x32xf32>
    %92 = vector.extract_strided_slice %88 {offsets = [0, 96], sizes = [8, 32], strides = [1, 1]} : vector<8x128xf32> to vector<8x32xf32>
    %93 = arith.mulf %90, %67 : vector<8x32xf32>
    %94 = arith.mulf %89, %92 : vector<8x32xf32>
    %95 = arith.addf %93, %94 : vector<8x32xf32>
    %96 = math.tanh %95 : vector<8x32xf32>
    %97 = arith.mulf %91, %96 : vector<8x32xf32>
    %98 = arith.index_cast %c2_i32 : i32 to index
    %c0_33 = arith.constant 0 : index
    %c0_34 = arith.constant 0 : index
    %99 = vector.load %arg10[%98, %c0_33, %c0_34] : memref<8x8x32xf32, #tpu.memory_space<vmem>>, vector<1x8x32xf32>
    %100 = vector.shape_cast %99 : vector<1x8x32xf32> to vector<8x32xf32>
    %101 = vector.shape_cast %97 : vector<8x32xf32> to vector<1x8x32xf32>
    tpu.vector_store %arg10[%98, %c0_33, %c0_34], %101 {strides = array<i32>} : memref<8x8x32xf32, #tpu.memory_space<vmem>>, vector<1x8x32xf32>,
    %c3_i32 = arith.constant 3 : i32
    %102 = arith.index_cast %c3_i32 : i32 to index
    %c0_35 = arith.constant 0 : index
    %c0_36 = arith.constant 0 : index
    %103 = vector.load %arg9[%102, %c0_35, %c0_36] : memref<8x8x128xf32, #tpu.memory_space<vmem>>, vector<1x8x128xf32>
    %104 = vector.shape_cast %103 : vector<1x8x128xf32> to vector<8x128xf32>
    %105 = arith.index_cast %c0_i32 : i32 to index
    %c0_37 = arith.constant 0 : index
    %c0_38 = arith.constant 0 : index
    %106 = vector.load %arg4[%105, %c0_37, %c0_38] : memref<2x32x128xf32, #tpu.memory_space<vmem>>, vector<1x32x128xf32>
    %107 = vector.shape_cast %106 : vector<1x32x128xf32> to vector<32x128xf32>
    %cst_39 = arith.constant dense<0.000000e+00> : vector<8x128xf32>
    %108 = tpu.matmul %97, %107, %cst_39 {dimension_numbers = #tpu.dot_dimension_numbers<[1], [0], [0], [1], [0, 0, 1, 1], [], []>} : vector<8x32xf32>, vector<32x128xf32>, vector<8x128xf32> -> vector<8x128xf32>
    %109 = arith.addf %104, %108 : vector<8x128xf32>
    %110 = arith.negf %109 : vector<8x128xf32>
    %111 = math.exp %110 : vector<8x128xf32>
    %cst_40 = arith.constant 1.000000e+00 : f32
    %112 = vector.broadcast %cst_40 : f32 to vector<8x128xf32>
    %113 = arith.addf %112, %111 : vector<8x128xf32>
    %114 = arith.divf %112, %113 : vector<8x128xf32>
    %115 = math.tanh %109 : vector<8x128xf32>
    %116 = arith.select %2, %114, %115 : vector<8x128xi1>, vector<8x128xf32>
    %117 = vector.extract_strided_slice %116 {offsets = [0, 0], sizes = [8, 32], strides = [1, 1]} : vector<8x128xf32> to vector<8x32xf32>
    %118 = vector.extract_strided_slice %116 {offsets = [0, 32], sizes = [8, 32], strides = [1, 1]} : vector<8x128xf32> to vector<8x32xf32>
    %119 = vector.extract_strided_slice %116 {offsets = [0, 64], sizes = [8, 32], strides = [1, 1]} : vector<8x128xf32> to vector<8x32xf32>
    %120 = vector.extract_strided_slice %116 {offsets = [0, 96], sizes = [8, 32], strides = [1, 1]} : vector<8x128xf32> to vector<8x32xf32>
    %121 = arith.mulf %118, %95 : vector<8x32xf32>
    %122 = arith.mulf %117, %120 : vector<8x32xf32>
    %123 = arith.addf %121, %122 : vector<8x32xf32>
    %124 = math.tanh %123 : vector<8x32xf32>
    %125 = arith.mulf %119, %124 : vector<8x32xf32>
    %126 = arith.index_cast %c3_i32 : i32 to index
    %c0_41 = arith.constant 0 : index
    %c0_42 = arith.constant 0 : index
    %127 = vector.load %arg10[%126, %c0_41, %c0_42] : memref<8x8x32xf32, #tpu.memory_space<vmem>>, vector<1x8x32xf32>
    %128 = vector.shape_cast %127 : vector<1x8x32xf32> to vector<8x32xf32>
    %129 = vector.shape_cast %125 : vector<8x32xf32> to vector<1x8x32xf32>
    tpu.vector_store %arg10[%126, %c0_41, %c0_42], %129 {strides = array<i32>} : memref<8x8x32xf32, #tpu.memory_space<vmem>>, vector<1x8x32xf32>,
    %c4_i32 = arith.constant 4 : i32
    %130 = arith.index_cast %c4_i32 : i32 to index
    %c0_43 = arith.constant 0 : index
    %c0_44 = arith.constant 0 : index
    %131 = vector.load %arg9[%130, %c0_43, %c0_44] : memref<8x8x128xf32, #tpu.memory_space<vmem>>, vector<1x8x128xf32>
    %132 = vector.shape_cast %131 : vector<1x8x128xf32> to vector<8x128xf32>
    %133 = arith.index_cast %c0_i32 : i32 to index
    %c0_45 = arith.constant 0 : index
    %c0_46 = arith.constant 0 : index
    %134 = vector.load %arg4[%133, %c0_45, %c0_46] : memref<2x32x128xf32, #tpu.memory_space<vmem>>, vector<1x32x128xf32>
    %135 = vector.shape_cast %134 : vector<1x32x128xf32> to vector<32x128xf32>
    %cst_47 = arith.constant dense<0.000000e+00> : vector<8x128xf32>
    %136 = tpu.matmul %125, %135, %cst_47 {dimension_numbers = #tpu.dot_dimension_numbers<[1], [0], [0], [1], [0, 0, 1, 1], [], []>} : vector<8x32xf32>, vector<32x128xf32>, vector<8x128xf32> -> vector<8x128xf32>
    %137 = arith.addf %132, %136 : vector<8x128xf32>
    %138 = arith.negf %137 : vector<8x128xf32>
    %139 = math.exp %138 : vector<8x128xf32>
    %cst_48 = arith.constant 1.000000e+00 : f32
    %140 = vector.broadcast %cst_48 : f32 to vector<8x128xf32>
    %141 = arith.addf %140, %139 : vector<8x128xf32>
    %142 = arith.divf %140, %141 : vector<8x128xf32>
    %143 = math.tanh %137 : vector<8x128xf32>
    %144 = arith.select %2, %142, %143 : vector<8x128xi1>, vector<8x128xf32>
    %145 = vector.extract_strided_slice %144 {offsets = [0, 0], sizes = [8, 32], strides = [1, 1]} : vector<8x128xf32> to vector<8x32xf32>
    %146 = vector.extract_strided_slice %144 {offsets = [0, 32], sizes = [8, 32], strides = [1, 1]} : vector<8x128xf32> to vector<8x32xf32>
    %147 = vector.extract_strided_slice %144 {offsets = [0, 64], sizes = [8, 32], strides = [1, 1]} : vector<8x128xf32> to vector<8x32xf32>
    %148 = vector.extract_strided_slice %144 {offsets = [0, 96], sizes = [8, 32], strides = [1, 1]} : vector<8x128xf32> to vector<8x32xf32>
    %149 = arith.mulf %146, %123 : vector<8x32xf32>
    %150 = arith.mulf %145, %148 : vector<8x32xf32>
    %151 = arith.addf %149, %150 : vector<8x32xf32>
    %152 = math.tanh %151 : vector<8x32xf32>
    %153 = arith.mulf %147, %152 : vector<8x32xf32>
    %154 = arith.index_cast %c4_i32 : i32 to index
    %c0_49 = arith.constant 0 : index
    %c0_50 = arith.constant 0 : index
    %155 = vector.load %arg10[%154, %c0_49, %c0_50] : memref<8x8x32xf32, #tpu.memory_space<vmem>>, vector<1x8x32xf32>
    %156 = vector.shape_cast %155 : vector<1x8x32xf32> to vector<8x32xf32>
    %157 = vector.shape_cast %153 : vector<8x32xf32> to vector<1x8x32xf32>
    tpu.vector_store %arg10[%154, %c0_49, %c0_50], %157 {strides = array<i32>} : memref<8x8x32xf32, #tpu.memory_space<vmem>>, vector<1x8x32xf32>,
    %c5_i32 = arith.constant 5 : i32
    %158 = arith.index_cast %c5_i32 : i32 to index
    %c0_51 = arith.constant 0 : index
    %c0_52 = arith.constant 0 : index
    %159 = vector.load %arg9[%158, %c0_51, %c0_52] : memref<8x8x128xf32, #tpu.memory_space<vmem>>, vector<1x8x128xf32>
    %160 = vector.shape_cast %159 : vector<1x8x128xf32> to vector<8x128xf32>
    %161 = arith.index_cast %c0_i32 : i32 to index
    %c0_53 = arith.constant 0 : index
    %c0_54 = arith.constant 0 : index
    %162 = vector.load %arg4[%161, %c0_53, %c0_54] : memref<2x32x128xf32, #tpu.memory_space<vmem>>, vector<1x32x128xf32>
    %163 = vector.shape_cast %162 : vector<1x32x128xf32> to vector<32x128xf32>
    %cst_55 = arith.constant dense<0.000000e+00> : vector<8x128xf32>
    %164 = tpu.matmul %153, %163, %cst_55 {dimension_numbers = #tpu.dot_dimension_numbers<[1], [0], [0], [1], [0, 0, 1, 1], [], []>} : vector<8x32xf32>, vector<32x128xf32>, vector<8x128xf32> -> vector<8x128xf32>
    %165 = arith.addf %160, %164 : vector<8x128xf32>
    %166 = arith.negf %165 : vector<8x128xf32>
    %167 = math.exp %166 : vector<8x128xf32>
    %cst_56 = arith.constant 1.000000e+00 : f32
    %168 = vector.broadcast %cst_56 : f32 to vector<8x128xf32>
    %169 = arith.addf %168, %167 : vector<8x128xf32>
    %170 = arith.divf %168, %169 : vector<8x128xf32>
    %171 = math.tanh %165 : vector<8x128xf32>
    %172 = arith.select %2, %170, %171 : vector<8x128xi1>, vector<8x128xf32>
    %173 = vector.extract_strided_slice %172 {offsets = [0, 0], sizes = [8, 32], strides = [1, 1]} : vector<8x128xf32> to vector<8x32xf32>
    %174 = vector.extract_strided_slice %172 {offsets = [0, 32], sizes = [8, 32], strides = [1, 1]} : vector<8x128xf32> to vector<8x32xf32>
    %175 = vector.extract_strided_slice %172 {offsets = [0, 64], sizes = [8, 32], strides = [1, 1]} : vector<8x128xf32> to vector<8x32xf32>
    %176 = vector.extract_strided_slice %172 {offsets = [0, 96], sizes = [8, 32], strides = [1, 1]} : vector<8x128xf32> to vector<8x32xf32>
    %177 = arith.mulf %174, %151 : vector<8x32xf32>
    %178 = arith.mulf %173, %176 : vector<8x32xf32>
    %179 = arith.addf %177, %178 : vector<8x32xf32>
    %180 = math.tanh %179 : vector<8x32xf32>
    %181 = arith.mulf %175, %180 : vector<8x32xf32>
    %182 = arith.index_cast %c5_i32 : i32 to index
    %c0_57 = arith.constant 0 : index
    %c0_58 = arith.constant 0 : index
    %183 = vector.load %arg10[%182, %c0_57, %c0_58] : memref<8x8x32xf32, #tpu.memory_space<vmem>>, vector<1x8x32xf32>
    %184 = vector.shape_cast %183 : vector<1x8x32xf32> to vector<8x32xf32>
    %185 = vector.shape_cast %181 : vector<8x32xf32> to vector<1x8x32xf32>
    tpu.vector_store %arg10[%182, %c0_57, %c0_58], %185 {strides = array<i32>} : memref<8x8x32xf32, #tpu.memory_space<vmem>>, vector<1x8x32xf32>,
    %c6_i32 = arith.constant 6 : i32
    %186 = arith.index_cast %c6_i32 : i32 to index
    %c0_59 = arith.constant 0 : index
    %c0_60 = arith.constant 0 : index
    %187 = vector.load %arg9[%186, %c0_59, %c0_60] : memref<8x8x128xf32, #tpu.memory_space<vmem>>, vector<1x8x128xf32>
    %188 = vector.shape_cast %187 : vector<1x8x128xf32> to vector<8x128xf32>
    %189 = arith.index_cast %c0_i32 : i32 to index
    %c0_61 = arith.constant 0 : index
    %c0_62 = arith.constant 0 : index
    %190 = vector.load %arg4[%189, %c0_61, %c0_62] : memref<2x32x128xf32, #tpu.memory_space<vmem>>, vector<1x32x128xf32>
    %191 = vector.shape_cast %190 : vector<1x32x128xf32> to vector<32x128xf32>
    %cst_63 = arith.constant dense<0.000000e+00> : vector<8x128xf32>
    %192 = tpu.matmul %181, %191, %cst_63 {dimension_numbers = #tpu.dot_dimension_numbers<[1], [0], [0], [1], [0, 0, 1, 1], [], []>} : vector<8x32xf32>, vector<32x128xf32>, vector<8x128xf32> -> vector<8x128xf32>
    %193 = arith.addf %188, %192 : vector<8x128xf32>
    %194 = arith.negf %193 : vector<8x128xf32>
    %195 = math.exp %194 : vector<8x128xf32>
    %cst_64 = arith.constant 1.000000e+00 : f32
    %196 = vector.broadcast %cst_64 : f32 to vector<8x128xf32>
    %197 = arith.addf %196, %195 : vector<8x128xf32>
    %198 = arith.divf %196, %197 : vector<8x128xf32>
    %199 = math.tanh %193 : vector<8x128xf32>
    %200 = arith.select %2, %198, %199 : vector<8x128xi1>, vector<8x128xf32>
    %201 = vector.extract_strided_slice %200 {offsets = [0, 0], sizes = [8, 32], strides = [1, 1]} : vector<8x128xf32> to vector<8x32xf32>
    %202 = vector.extract_strided_slice %200 {offsets = [0, 32], sizes = [8, 32], strides = [1, 1]} : vector<8x128xf32> to vector<8x32xf32>
    %203 = vector.extract_strided_slice %200 {offsets = [0, 64], sizes = [8, 32], strides = [1, 1]} : vector<8x128xf32> to vector<8x32xf32>
    %204 = vector.extract_strided_slice %200 {offsets = [0, 96], sizes = [8, 32], strides = [1, 1]} : vector<8x128xf32> to vector<8x32xf32>
    %205 = arith.mulf %202, %179 : vector<8x32xf32>
    %206 = arith.mulf %201, %204 : vector<8x32xf32>
    %207 = arith.addf %205, %206 : vector<8x32xf32>
    %208 = math.tanh %207 : vector<8x32xf32>
    %209 = arith.mulf %203, %208 : vector<8x32xf32>
    %210 = arith.index_cast %c6_i32 : i32 to index
    %c0_65 = arith.constant 0 : index
    %c0_66 = arith.constant 0 : index
    %211 = vector.load %arg10[%210, %c0_65, %c0_66] : memref<8x8x32xf32, #tpu.memory_space<vmem>>, vector<1x8x32xf32>
    %212 = vector.shape_cast %211 : vector<1x8x32xf32> to vector<8x32xf32>
    %213 = vector.shape_cast %209 : vector<8x32xf32> to vector<1x8x32xf32>
    tpu.vector_store %arg10[%210, %c0_65, %c0_66], %213 {strides = array<i32>} : memref<8x8x32xf32, #tpu.memory_space<vmem>>, vector<1x8x32xf32>,
    %c7_i32 = arith.constant 7 : i32
    %214 = arith.index_cast %c7_i32 : i32 to index
    %c0_67 = arith.constant 0 : index
    %c0_68 = arith.constant 0 : index
    %215 = vector.load %arg9[%214, %c0_67, %c0_68] : memref<8x8x128xf32, #tpu.memory_space<vmem>>, vector<1x8x128xf32>
    %216 = vector.shape_cast %215 : vector<1x8x128xf32> to vector<8x128xf32>
    %217 = arith.index_cast %c0_i32 : i32 to index
    %c0_69 = arith.constant 0 : index
    %c0_70 = arith.constant 0 : index
    %218 = vector.load %arg4[%217, %c0_69, %c0_70] : memref<2x32x128xf32, #tpu.memory_space<vmem>>, vector<1x32x128xf32>
    %219 = vector.shape_cast %218 : vector<1x32x128xf32> to vector<32x128xf32>
    %cst_71 = arith.constant dense<0.000000e+00> : vector<8x128xf32>
    %220 = tpu.matmul %209, %219, %cst_71 {dimension_numbers = #tpu.dot_dimension_numbers<[1], [0], [0], [1], [0, 0, 1, 1], [], []>} : vector<8x32xf32>, vector<32x128xf32>, vector<8x128xf32> -> vector<8x128xf32>
    %221 = arith.addf %216, %220 : vector<8x128xf32>
    %222 = arith.negf %221 : vector<8x128xf32>
    %223 = math.exp %222 : vector<8x128xf32>
    %cst_72 = arith.constant 1.000000e+00 : f32
    %224 = vector.broadcast %cst_72 : f32 to vector<8x128xf32>
    %225 = arith.addf %224, %223 : vector<8x128xf32>
    %226 = arith.divf %224, %225 : vector<8x128xf32>
    %227 = math.tanh %221 : vector<8x128xf32>
    %228 = arith.select %2, %226, %227 : vector<8x128xi1>, vector<8x128xf32>
    %229 = vector.extract_strided_slice %228 {offsets = [0, 0], sizes = [8, 32], strides = [1, 1]} : vector<8x128xf32> to vector<8x32xf32>
    %230 = vector.extract_strided_slice %228 {offsets = [0, 32], sizes = [8, 32], strides = [1, 1]} : vector<8x128xf32> to vector<8x32xf32>
    %231 = vector.extract_strided_slice %228 {offsets = [0, 64], sizes = [8, 32], strides = [1, 1]} : vector<8x128xf32> to vector<8x32xf32>
    %232 = vector.extract_strided_slice %228 {offsets = [0, 96], sizes = [8, 32], strides = [1, 1]} : vector<8x128xf32> to vector<8x32xf32>
    %233 = arith.mulf %230, %207 : vector<8x32xf32>
    %234 = arith.mulf %229, %232 : vector<8x32xf32>
    %235 = arith.addf %233, %234 : vector<8x32xf32>
    %236 = math.tanh %235 : vector<8x32xf32>
    %237 = arith.mulf %231, %236 : vector<8x32xf32>
    %238 = arith.index_cast %c7_i32 : i32 to index
    %c0_73 = arith.constant 0 : index
    %c0_74 = arith.constant 0 : index
    %239 = vector.load %arg10[%238, %c0_73, %c0_74] : memref<8x8x32xf32, #tpu.memory_space<vmem>>, vector<1x8x32xf32>
    %240 = vector.shape_cast %239 : vector<1x8x32xf32> to vector<8x32xf32>
    %241 = vector.shape_cast %237 : vector<8x32xf32> to vector<1x8x32xf32>
    tpu.vector_store %arg10[%238, %c0_73, %c0_74], %241 {strides = array<i32>} : memref<8x8x32xf32, #tpu.memory_space<vmem>>, vector<1x8x32xf32>,
    %c8_i32 = arith.constant 8 : i32
    %c0_75 = arith.constant 0 : index
    %c0_76 = arith.constant 0 : index
    %c0_77 = arith.constant 0 : index
    %242 = vector.load %arg10[%c0_75, %c0_76, %c0_77] : memref<8x8x32xf32, #tpu.memory_space<vmem>>, vector<8x8x32xf32>
    %243 = vector.shape_cast %242 : vector<8x8x32xf32> to vector<64x32xf32>
    %c0_78 = arith.constant 0 : index
    %c0_79 = arith.constant 0 : index
    %c0_80 = arith.constant 0 : index
    %244 = vector.load %arg3[%c0_78, %c0_79, %c0_80] : memref<1x32x128xf32, #tpu.memory_space<vmem>>, vector<1x32x128xf32>
    %245 = vector.shape_cast %244 : vector<1x32x128xf32> to vector<32x128xf32>
    %cst_81 = arith.constant dense<0.000000e+00> : vector<64x128xf32>
    %246 = tpu.matmul %243, %245, %cst_81 {dimension_numbers = #tpu.dot_dimension_numbers<[1], [0], [0], [1], [0, 0, 1, 1], [], []>} : vector<64x32xf32>, vector<32x128xf32>, vector<64x128xf32> -> vector<64x128xf32>
    %247 = vector.shape_cast %246 : vector<64x128xf32> to vector<8x8x128xf32>
    %c1 = arith.constant 1 : index
    %c0_82 = arith.constant 0 : index
    %c0_83 = arith.constant 0 : index
    %248 = vector.load %arg5[%c1, %c0_82, %c0_83] : memref<2x1x128xf32, #tpu.memory_space<vmem>>, vector<1x1x128xf32>
    %249 = vector.shape_cast %248 : vector<1x1x128xf32> to vector<1x128xf32>
    %250 = vector.shape_cast %249 : vector<1x128xf32> to vector<1x1x128xf32>
    %251 = vector.broadcast %250 : vector<1x1x128xf32> to vector<8x8x128xf32>
    %252 = arith.addf %247, %251 : vector<8x8x128xf32>
    %c0_84 = arith.constant 0 : index
    %c0_85 = arith.constant 0 : index
    %c0_86 = arith.constant 0 : index
    %253 = vector.load %arg9[%c0_84, %c0_85, %c0_86] : memref<8x8x128xf32, #tpu.memory_space<vmem>>, vector<8x8x128xf32>
    tpu.vector_store %arg9[%c0_84, %c0_85, %c0_86], %252 {strides = array<i32>} : memref<8x8x128xf32, #tpu.memory_space<vmem>>, vector<8x8x128xf32>,
    %cst_87 = arith.constant 0.000000e+00 : f32
    %254 = vector.broadcast %cst_87 : f32 to vector<8x32xf32>
    %cst_88 = arith.constant 0.000000e+00 : f32
    %255 = vector.broadcast %cst_88 : f32 to vector<8x32xf32>
    %c1_i32_89 = arith.constant 1 : i32
    %c0_i32_90 = arith.constant 0 : i32
    %256 = arith.index_cast %c0_i32_90 : i32 to index
    %c0_91 = arith.constant 0 : index
    %c0_92 = arith.constant 0 : index
    %257 = vector.load %arg9[%256, %c0_91, %c0_92] : memref<8x8x128xf32, #tpu.memory_space<vmem>>, vector<1x8x128xf32>
    %258 = vector.shape_cast %257 : vector<1x8x128xf32> to vector<8x128xf32>
    %259 = arith.index_cast %c1_i32_89 : i32 to index
    %c0_93 = arith.constant 0 : index
    %c0_94 = arith.constant 0 : index
    %260 = vector.load %arg4[%259, %c0_93, %c0_94] : memref<2x32x128xf32, #tpu.memory_space<vmem>>, vector<1x32x128xf32>
    %261 = vector.shape_cast %260 : vector<1x32x128xf32> to vector<32x128xf32>
    %cst_95 = arith.constant dense<0.000000e+00> : vector<8x128xf32>
    %262 = tpu.matmul %254, %261, %cst_95 {dimension_numbers = #tpu.dot_dimension_numbers<[1], [0], [0], [1], [0, 0, 1, 1], [], []>} : vector<8x32xf32>, vector<32x128xf32>, vector<8x128xf32> -> vector<8x128xf32>
    %263 = arith.addf %258, %262 : vector<8x128xf32>
    %264 = arith.negf %263 : vector<8x128xf32>
    %265 = math.exp %264 : vector<8x128xf32>
    %cst_96 = arith.constant 1.000000e+00 : f32
    %266 = vector.broadcast %cst_96 : f32 to vector<8x128xf32>
    %267 = arith.addf %266, %265 : vector<8x128xf32>
    %268 = arith.divf %266, %267 : vector<8x128xf32>
    %269 = math.tanh %263 : vector<8x128xf32>
    %270 = arith.select %2, %268, %269 : vector<8x128xi1>, vector<8x128xf32>
    %271 = vector.extract_strided_slice %270 {offsets = [0, 0], sizes = [8, 32], strides = [1, 1]} : vector<8x128xf32> to vector<8x32xf32>
    %272 = vector.extract_strided_slice %270 {offsets = [0, 32], sizes = [8, 32], strides = [1, 1]} : vector<8x128xf32> to vector<8x32xf32>
    %273 = vector.extract_strided_slice %270 {offsets = [0, 64], sizes = [8, 32], strides = [1, 1]} : vector<8x128xf32> to vector<8x32xf32>
    %274 = vector.extract_strided_slice %270 {offsets = [0, 96], sizes = [8, 32], strides = [1, 1]} : vector<8x128xf32> to vector<8x32xf32>
    %275 = arith.mulf %272, %255 : vector<8x32xf32>
    %276 = arith.mulf %271, %274 : vector<8x32xf32>
    %277 = arith.addf %275, %276 : vector<8x32xf32>
    %278 = math.tanh %277 : vector<8x32xf32>
    %279 = arith.mulf %273, %278 : vector<8x32xf32>
    %280 = arith.index_cast %c0_i32_90 : i32 to index
    %c0_97 = arith.constant 0 : index
    %c0_98 = arith.constant 0 : index
    %281 = vector.load %arg10[%280, %c0_97, %c0_98] : memref<8x8x32xf32, #tpu.memory_space<vmem>>, vector<1x8x32xf32>
    %282 = vector.shape_cast %281 : vector<1x8x32xf32> to vector<8x32xf32>
    %283 = vector.shape_cast %279 : vector<8x32xf32> to vector<1x8x32xf32>
    tpu.vector_store %arg10[%280, %c0_97, %c0_98], %283 {strides = array<i32>} : memref<8x8x32xf32, #tpu.memory_space<vmem>>, vector<1x8x32xf32>,
    %c1_i32_99 = arith.constant 1 : i32
    %284 = arith.index_cast %c1_i32_99 : i32 to index
    %c0_100 = arith.constant 0 : index
    %c0_101 = arith.constant 0 : index
    %285 = vector.load %arg9[%284, %c0_100, %c0_101] : memref<8x8x128xf32, #tpu.memory_space<vmem>>, vector<1x8x128xf32>
    %286 = vector.shape_cast %285 : vector<1x8x128xf32> to vector<8x128xf32>
    %287 = arith.index_cast %c1_i32_89 : i32 to index
    %c0_102 = arith.constant 0 : index
    %c0_103 = arith.constant 0 : index
    %288 = vector.load %arg4[%287, %c0_102, %c0_103] : memref<2x32x128xf32, #tpu.memory_space<vmem>>, vector<1x32x128xf32>
    %289 = vector.shape_cast %288 : vector<1x32x128xf32> to vector<32x128xf32>
    %cst_104 = arith.constant dense<0.000000e+00> : vector<8x128xf32>
    %290 = tpu.matmul %279, %289, %cst_104 {dimension_numbers = #tpu.dot_dimension_numbers<[1], [0], [0], [1], [0, 0, 1, 1], [], []>} : vector<8x32xf32>, vector<32x128xf32>, vector<8x128xf32> -> vector<8x128xf32>
    %291 = arith.addf %286, %290 : vector<8x128xf32>
    %292 = arith.negf %291 : vector<8x128xf32>
    %293 = math.exp %292 : vector<8x128xf32>
    %cst_105 = arith.constant 1.000000e+00 : f32
    %294 = vector.broadcast %cst_105 : f32 to vector<8x128xf32>
    %295 = arith.addf %294, %293 : vector<8x128xf32>
    %296 = arith.divf %294, %295 : vector<8x128xf32>
    %297 = math.tanh %291 : vector<8x128xf32>
    %298 = arith.select %2, %296, %297 : vector<8x128xi1>, vector<8x128xf32>
    %299 = vector.extract_strided_slice %298 {offsets = [0, 0], sizes = [8, 32], strides = [1, 1]} : vector<8x128xf32> to vector<8x32xf32>
    %300 = vector.extract_strided_slice %298 {offsets = [0, 32], sizes = [8, 32], strides = [1, 1]} : vector<8x128xf32> to vector<8x32xf32>
    %301 = vector.extract_strided_slice %298 {offsets = [0, 64], sizes = [8, 32], strides = [1, 1]} : vector<8x128xf32> to vector<8x32xf32>
    %302 = vector.extract_strided_slice %298 {offsets = [0, 96], sizes = [8, 32], strides = [1, 1]} : vector<8x128xf32> to vector<8x32xf32>
    %303 = arith.mulf %300, %277 : vector<8x32xf32>
    %304 = arith.mulf %299, %302 : vector<8x32xf32>
    %305 = arith.addf %303, %304 : vector<8x32xf32>
    %306 = math.tanh %305 : vector<8x32xf32>
    %307 = arith.mulf %301, %306 : vector<8x32xf32>
    %308 = arith.index_cast %c1_i32_99 : i32 to index
    %c0_106 = arith.constant 0 : index
    %c0_107 = arith.constant 0 : index
    %309 = vector.load %arg10[%308, %c0_106, %c0_107] : memref<8x8x32xf32, #tpu.memory_space<vmem>>, vector<1x8x32xf32>
    %310 = vector.shape_cast %309 : vector<1x8x32xf32> to vector<8x32xf32>
    %311 = vector.shape_cast %307 : vector<8x32xf32> to vector<1x8x32xf32>
    tpu.vector_store %arg10[%308, %c0_106, %c0_107], %311 {strides = array<i32>} : memref<8x8x32xf32, #tpu.memory_space<vmem>>, vector<1x8x32xf32>,
    %c2_i32_108 = arith.constant 2 : i32
    %312 = arith.index_cast %c2_i32_108 : i32 to index
    %c0_109 = arith.constant 0 : index
    %c0_110 = arith.constant 0 : index
    %313 = vector.load %arg9[%312, %c0_109, %c0_110] : memref<8x8x128xf32, #tpu.memory_space<vmem>>, vector<1x8x128xf32>
    %314 = vector.shape_cast %313 : vector<1x8x128xf32> to vector<8x128xf32>
    %315 = arith.index_cast %c1_i32_89 : i32 to index
    %c0_111 = arith.constant 0 : index
    %c0_112 = arith.constant 0 : index
    %316 = vector.load %arg4[%315, %c0_111, %c0_112] : memref<2x32x128xf32, #tpu.memory_space<vmem>>, vector<1x32x128xf32>
    %317 = vector.shape_cast %316 : vector<1x32x128xf32> to vector<32x128xf32>
    %cst_113 = arith.constant dense<0.000000e+00> : vector<8x128xf32>
    %318 = tpu.matmul %307, %317, %cst_113 {dimension_numbers = #tpu.dot_dimension_numbers<[1], [0], [0], [1], [0, 0, 1, 1], [], []>} : vector<8x32xf32>, vector<32x128xf32>, vector<8x128xf32> -> vector<8x128xf32>
    %319 = arith.addf %314, %318 : vector<8x128xf32>
    %320 = arith.negf %319 : vector<8x128xf32>
    %321 = math.exp %320 : vector<8x128xf32>
    %cst_114 = arith.constant 1.000000e+00 : f32
    %322 = vector.broadcast %cst_114 : f32 to vector<8x128xf32>
    %323 = arith.addf %322, %321 : vector<8x128xf32>
    %324 = arith.divf %322, %323 : vector<8x128xf32>
    %325 = math.tanh %319 : vector<8x128xf32>
    %326 = arith.select %2, %324, %325 : vector<8x128xi1>, vector<8x128xf32>
    %327 = vector.extract_strided_slice %326 {offsets = [0, 0], sizes = [8, 32], strides = [1, 1]} : vector<8x128xf32> to vector<8x32xf32>
    %328 = vector.extract_strided_slice %326 {offsets = [0, 32], sizes = [8, 32], strides = [1, 1]} : vector<8x128xf32> to vector<8x32xf32>
    %329 = vector.extract_strided_slice %326 {offsets = [0, 64], sizes = [8, 32], strides = [1, 1]} : vector<8x128xf32> to vector<8x32xf32>
    %330 = vector.extract_strided_slice %326 {offsets = [0, 96], sizes = [8, 32], strides = [1, 1]} : vector<8x128xf32> to vector<8x32xf32>
    %331 = arith.mulf %328, %305 : vector<8x32xf32>
    %332 = arith.mulf %327, %330 : vector<8x32xf32>
    %333 = arith.addf %331, %332 : vector<8x32xf32>
    %334 = math.tanh %333 : vector<8x32xf32>
    %335 = arith.mulf %329, %334 : vector<8x32xf32>
    %336 = arith.index_cast %c2_i32_108 : i32 to index
    %c0_115 = arith.constant 0 : index
    %c0_116 = arith.constant 0 : index
    %337 = vector.load %arg10[%336, %c0_115, %c0_116] : memref<8x8x32xf32, #tpu.memory_space<vmem>>, vector<1x8x32xf32>
    %338 = vector.shape_cast %337 : vector<1x8x32xf32> to vector<8x32xf32>
    %339 = vector.shape_cast %335 : vector<8x32xf32> to vector<1x8x32xf32>
    tpu.vector_store %arg10[%336, %c0_115, %c0_116], %339 {strides = array<i32>} : memref<8x8x32xf32, #tpu.memory_space<vmem>>, vector<1x8x32xf32>,
    %c3_i32_117 = arith.constant 3 : i32
    %340 = arith.index_cast %c3_i32_117 : i32 to index
    %c0_118 = arith.constant 0 : index
    %c0_119 = arith.constant 0 : index
    %341 = vector.load %arg9[%340, %c0_118, %c0_119] : memref<8x8x128xf32, #tpu.memory_space<vmem>>, vector<1x8x128xf32>
    %342 = vector.shape_cast %341 : vector<1x8x128xf32> to vector<8x128xf32>
    %343 = arith.index_cast %c1_i32_89 : i32 to index
    %c0_120 = arith.constant 0 : index
    %c0_121 = arith.constant 0 : index
    %344 = vector.load %arg4[%343, %c0_120, %c0_121] : memref<2x32x128xf32, #tpu.memory_space<vmem>>, vector<1x32x128xf32>
    %345 = vector.shape_cast %344 : vector<1x32x128xf32> to vector<32x128xf32>
    %cst_122 = arith.constant dense<0.000000e+00> : vector<8x128xf32>
    %346 = tpu.matmul %335, %345, %cst_122 {dimension_numbers = #tpu.dot_dimension_numbers<[1], [0], [0], [1], [0, 0, 1, 1], [], []>} : vector<8x32xf32>, vector<32x128xf32>, vector<8x128xf32> -> vector<8x128xf32>
    %347 = arith.addf %342, %346 : vector<8x128xf32>
    %348 = arith.negf %347 : vector<8x128xf32>
    %349 = math.exp %348 : vector<8x128xf32>
    %cst_123 = arith.constant 1.000000e+00 : f32
    %350 = vector.broadcast %cst_123 : f32 to vector<8x128xf32>
    %351 = arith.addf %350, %349 : vector<8x128xf32>
    %352 = arith.divf %350, %351 : vector<8x128xf32>
    %353 = math.tanh %347 : vector<8x128xf32>
    %354 = arith.select %2, %352, %353 : vector<8x128xi1>, vector<8x128xf32>
    %355 = vector.extract_strided_slice %354 {offsets = [0, 0], sizes = [8, 32], strides = [1, 1]} : vector<8x128xf32> to vector<8x32xf32>
    %356 = vector.extract_strided_slice %354 {offsets = [0, 32], sizes = [8, 32], strides = [1, 1]} : vector<8x128xf32> to vector<8x32xf32>
    %357 = vector.extract_strided_slice %354 {offsets = [0, 64], sizes = [8, 32], strides = [1, 1]} : vector<8x128xf32> to vector<8x32xf32>
    %358 = vector.extract_strided_slice %354 {offsets = [0, 96], sizes = [8, 32], strides = [1, 1]} : vector<8x128xf32> to vector<8x32xf32>
    %359 = arith.mulf %356, %333 : vector<8x32xf32>
    %360 = arith.mulf %355, %358 : vector<8x32xf32>
    %361 = arith.addf %359, %360 : vector<8x32xf32>
    %362 = math.tanh %361 : vector<8x32xf32>
    %363 = arith.mulf %357, %362 : vector<8x32xf32>
    %364 = arith.index_cast %c3_i32_117 : i32 to index
    %c0_124 = arith.constant 0 : index
    %c0_125 = arith.constant 0 : index
    %365 = vector.load %arg10[%364, %c0_124, %c0_125] : memref<8x8x32xf32, #tpu.memory_space<vmem>>, vector<1x8x32xf32>
    %366 = vector.shape_cast %365 : vector<1x8x32xf32> to vector<8x32xf32>
    %367 = vector.shape_cast %363 : vector<8x32xf32> to vector<1x8x32xf32>
    tpu.vector_store %arg10[%364, %c0_124, %c0_125], %367 {strides = array<i32>} : memref<8x8x32xf32, #tpu.memory_space<vmem>>, vector<1x8x32xf32>,
    %c4_i32_126 = arith.constant 4 : i32
    %368 = arith.index_cast %c4_i32_126 : i32 to index
    %c0_127 = arith.constant 0 : index
    %c0_128 = arith.constant 0 : index
    %369 = vector.load %arg9[%368, %c0_127, %c0_128] : memref<8x8x128xf32, #tpu.memory_space<vmem>>, vector<1x8x128xf32>
    %370 = vector.shape_cast %369 : vector<1x8x128xf32> to vector<8x128xf32>
    %371 = arith.index_cast %c1_i32_89 : i32 to index
    %c0_129 = arith.constant 0 : index
    %c0_130 = arith.constant 0 : index
    %372 = vector.load %arg4[%371, %c0_129, %c0_130] : memref<2x32x128xf32, #tpu.memory_space<vmem>>, vector<1x32x128xf32>
    %373 = vector.shape_cast %372 : vector<1x32x128xf32> to vector<32x128xf32>
    %cst_131 = arith.constant dense<0.000000e+00> : vector<8x128xf32>
    %374 = tpu.matmul %363, %373, %cst_131 {dimension_numbers = #tpu.dot_dimension_numbers<[1], [0], [0], [1], [0, 0, 1, 1], [], []>} : vector<8x32xf32>, vector<32x128xf32>, vector<8x128xf32> -> vector<8x128xf32>
    %375 = arith.addf %370, %374 : vector<8x128xf32>
    %376 = arith.negf %375 : vector<8x128xf32>
    %377 = math.exp %376 : vector<8x128xf32>
    %cst_132 = arith.constant 1.000000e+00 : f32
    %378 = vector.broadcast %cst_132 : f32 to vector<8x128xf32>
    %379 = arith.addf %378, %377 : vector<8x128xf32>
    %380 = arith.divf %378, %379 : vector<8x128xf32>
    %381 = math.tanh %375 : vector<8x128xf32>
    %382 = arith.select %2, %380, %381 : vector<8x128xi1>, vector<8x128xf32>
    %383 = vector.extract_strided_slice %382 {offsets = [0, 0], sizes = [8, 32], strides = [1, 1]} : vector<8x128xf32> to vector<8x32xf32>
    %384 = vector.extract_strided_slice %382 {offsets = [0, 32], sizes = [8, 32], strides = [1, 1]} : vector<8x128xf32> to vector<8x32xf32>
    %385 = vector.extract_strided_slice %382 {offsets = [0, 64], sizes = [8, 32], strides = [1, 1]} : vector<8x128xf32> to vector<8x32xf32>
    %386 = vector.extract_strided_slice %382 {offsets = [0, 96], sizes = [8, 32], strides = [1, 1]} : vector<8x128xf32> to vector<8x32xf32>
    %387 = arith.mulf %384, %361 : vector<8x32xf32>
    %388 = arith.mulf %383, %386 : vector<8x32xf32>
    %389 = arith.addf %387, %388 : vector<8x32xf32>
    %390 = math.tanh %389 : vector<8x32xf32>
    %391 = arith.mulf %385, %390 : vector<8x32xf32>
    %392 = arith.index_cast %c4_i32_126 : i32 to index
    %c0_133 = arith.constant 0 : index
    %c0_134 = arith.constant 0 : index
    %393 = vector.load %arg10[%392, %c0_133, %c0_134] : memref<8x8x32xf32, #tpu.memory_space<vmem>>, vector<1x8x32xf32>
    %394 = vector.shape_cast %393 : vector<1x8x32xf32> to vector<8x32xf32>
    %395 = vector.shape_cast %391 : vector<8x32xf32> to vector<1x8x32xf32>
    tpu.vector_store %arg10[%392, %c0_133, %c0_134], %395 {strides = array<i32>} : memref<8x8x32xf32, #tpu.memory_space<vmem>>, vector<1x8x32xf32>,
    %c5_i32_135 = arith.constant 5 : i32
    %396 = arith.index_cast %c5_i32_135 : i32 to index
    %c0_136 = arith.constant 0 : index
    %c0_137 = arith.constant 0 : index
    %397 = vector.load %arg9[%396, %c0_136, %c0_137] : memref<8x8x128xf32, #tpu.memory_space<vmem>>, vector<1x8x128xf32>
    %398 = vector.shape_cast %397 : vector<1x8x128xf32> to vector<8x128xf32>
    %399 = arith.index_cast %c1_i32_89 : i32 to index
    %c0_138 = arith.constant 0 : index
    %c0_139 = arith.constant 0 : index
    %400 = vector.load %arg4[%399, %c0_138, %c0_139] : memref<2x32x128xf32, #tpu.memory_space<vmem>>, vector<1x32x128xf32>
    %401 = vector.shape_cast %400 : vector<1x32x128xf32> to vector<32x128xf32>
    %cst_140 = arith.constant dense<0.000000e+00> : vector<8x128xf32>
    %402 = tpu.matmul %391, %401, %cst_140 {dimension_numbers = #tpu.dot_dimension_numbers<[1], [0], [0], [1], [0, 0, 1, 1], [], []>} : vector<8x32xf32>, vector<32x128xf32>, vector<8x128xf32> -> vector<8x128xf32>
    %403 = arith.addf %398, %402 : vector<8x128xf32>
    %404 = arith.negf %403 : vector<8x128xf32>
    %405 = math.exp %404 : vector<8x128xf32>
    %cst_141 = arith.constant 1.000000e+00 : f32
    %406 = vector.broadcast %cst_141 : f32 to vector<8x128xf32>
    %407 = arith.addf %406, %405 : vector<8x128xf32>
    %408 = arith.divf %406, %407 : vector<8x128xf32>
    %409 = math.tanh %403 : vector<8x128xf32>
    %410 = arith.select %2, %408, %409 : vector<8x128xi1>, vector<8x128xf32>
    %411 = vector.extract_strided_slice %410 {offsets = [0, 0], sizes = [8, 32], strides = [1, 1]} : vector<8x128xf32> to vector<8x32xf32>
    %412 = vector.extract_strided_slice %410 {offsets = [0, 32], sizes = [8, 32], strides = [1, 1]} : vector<8x128xf32> to vector<8x32xf32>
    %413 = vector.extract_strided_slice %410 {offsets = [0, 64], sizes = [8, 32], strides = [1, 1]} : vector<8x128xf32> to vector<8x32xf32>
    %414 = vector.extract_strided_slice %410 {offsets = [0, 96], sizes = [8, 32], strides = [1, 1]} : vector<8x128xf32> to vector<8x32xf32>
    %415 = arith.mulf %412, %389 : vector<8x32xf32>
    %416 = arith.mulf %411, %414 : vector<8x32xf32>
    %417 = arith.addf %415, %416 : vector<8x32xf32>
    %418 = math.tanh %417 : vector<8x32xf32>
    %419 = arith.mulf %413, %418 : vector<8x32xf32>
    %420 = arith.index_cast %c5_i32_135 : i32 to index
    %c0_142 = arith.constant 0 : index
    %c0_143 = arith.constant 0 : index
    %421 = vector.load %arg10[%420, %c0_142, %c0_143] : memref<8x8x32xf32, #tpu.memory_space<vmem>>, vector<1x8x32xf32>
    %422 = vector.shape_cast %421 : vector<1x8x32xf32> to vector<8x32xf32>
    %423 = vector.shape_cast %419 : vector<8x32xf32> to vector<1x8x32xf32>
    tpu.vector_store %arg10[%420, %c0_142, %c0_143], %423 {strides = array<i32>} : memref<8x8x32xf32, #tpu.memory_space<vmem>>, vector<1x8x32xf32>,
    %c6_i32_144 = arith.constant 6 : i32
    %424 = arith.index_cast %c6_i32_144 : i32 to index
    %c0_145 = arith.constant 0 : index
    %c0_146 = arith.constant 0 : index
    %425 = vector.load %arg9[%424, %c0_145, %c0_146] : memref<8x8x128xf32, #tpu.memory_space<vmem>>, vector<1x8x128xf32>
    %426 = vector.shape_cast %425 : vector<1x8x128xf32> to vector<8x128xf32>
    %427 = arith.index_cast %c1_i32_89 : i32 to index
    %c0_147 = arith.constant 0 : index
    %c0_148 = arith.constant 0 : index
    %428 = vector.load %arg4[%427, %c0_147, %c0_148] : memref<2x32x128xf32, #tpu.memory_space<vmem>>, vector<1x32x128xf32>
    %429 = vector.shape_cast %428 : vector<1x32x128xf32> to vector<32x128xf32>
    %cst_149 = arith.constant dense<0.000000e+00> : vector<8x128xf32>
    %430 = tpu.matmul %419, %429, %cst_149 {dimension_numbers = #tpu.dot_dimension_numbers<[1], [0], [0], [1], [0, 0, 1, 1], [], []>} : vector<8x32xf32>, vector<32x128xf32>, vector<8x128xf32> -> vector<8x128xf32>
    %431 = arith.addf %426, %430 : vector<8x128xf32>
    %432 = arith.negf %431 : vector<8x128xf32>
    %433 = math.exp %432 : vector<8x128xf32>
    %cst_150 = arith.constant 1.000000e+00 : f32
    %434 = vector.broadcast %cst_150 : f32 to vector<8x128xf32>
    %435 = arith.addf %434, %433 : vector<8x128xf32>
    %436 = arith.divf %434, %435 : vector<8x128xf32>
    %437 = math.tanh %431 : vector<8x128xf32>
    %438 = arith.select %2, %436, %437 : vector<8x128xi1>, vector<8x128xf32>
    %439 = vector.extract_strided_slice %438 {offsets = [0, 0], sizes = [8, 32], strides = [1, 1]} : vector<8x128xf32> to vector<8x32xf32>
    %440 = vector.extract_strided_slice %438 {offsets = [0, 32], sizes = [8, 32], strides = [1, 1]} : vector<8x128xf32> to vector<8x32xf32>
    %441 = vector.extract_strided_slice %438 {offsets = [0, 64], sizes = [8, 32], strides = [1, 1]} : vector<8x128xf32> to vector<8x32xf32>
    %442 = vector.extract_strided_slice %438 {offsets = [0, 96], sizes = [8, 32], strides = [1, 1]} : vector<8x128xf32> to vector<8x32xf32>
    %443 = arith.mulf %440, %417 : vector<8x32xf32>
    %444 = arith.mulf %439, %442 : vector<8x32xf32>
    %445 = arith.addf %443, %444 : vector<8x32xf32>
    %446 = math.tanh %445 : vector<8x32xf32>
    %447 = arith.mulf %441, %446 : vector<8x32xf32>
    %448 = arith.index_cast %c6_i32_144 : i32 to index
    %c0_151 = arith.constant 0 : index
    %c0_152 = arith.constant 0 : index
    %449 = vector.load %arg10[%448, %c0_151, %c0_152] : memref<8x8x32xf32, #tpu.memory_space<vmem>>, vector<1x8x32xf32>
    %450 = vector.shape_cast %449 : vector<1x8x32xf32> to vector<8x32xf32>
    %451 = vector.shape_cast %447 : vector<8x32xf32> to vector<1x8x32xf32>
    tpu.vector_store %arg10[%448, %c0_151, %c0_152], %451 {strides = array<i32>} : memref<8x8x32xf32, #tpu.memory_space<vmem>>, vector<1x8x32xf32>,
    %c7_i32_153 = arith.constant 7 : i32
    %452 = arith.index_cast %c7_i32_153 : i32 to index
    %c0_154 = arith.constant 0 : index
    %c0_155 = arith.constant 0 : index
    %453 = vector.load %arg9[%452, %c0_154, %c0_155] : memref<8x8x128xf32, #tpu.memory_space<vmem>>, vector<1x8x128xf32>
    %454 = vector.shape_cast %453 : vector<1x8x128xf32> to vector<8x128xf32>
    %455 = arith.index_cast %c1_i32_89 : i32 to index
    %c0_156 = arith.constant 0 : index
    %c0_157 = arith.constant 0 : index
    %456 = vector.load %arg4[%455, %c0_156, %c0_157] : memref<2x32x128xf32, #tpu.memory_space<vmem>>, vector<1x32x128xf32>
    %457 = vector.shape_cast %456 : vector<1x32x128xf32> to vector<32x128xf32>
    %cst_158 = arith.constant dense<0.000000e+00> : vector<8x128xf32>
    %458 = tpu.matmul %447, %457, %cst_158 {dimension_numbers = #tpu.dot_dimension_numbers<[1], [0], [0], [1], [0, 0, 1, 1], [], []>} : vector<8x32xf32>, vector<32x128xf32>, vector<8x128xf32> -> vector<8x128xf32>
    %459 = arith.addf %454, %458 : vector<8x128xf32>
    %460 = arith.negf %459 : vector<8x128xf32>
    %461 = math.exp %460 : vector<8x128xf32>
    %cst_159 = arith.constant 1.000000e+00 : f32
    %462 = vector.broadcast %cst_159 : f32 to vector<8x128xf32>
    %463 = arith.addf %462, %461 : vector<8x128xf32>
    %464 = arith.divf %462, %463 : vector<8x128xf32>
    %465 = math.tanh %459 : vector<8x128xf32>
    %466 = arith.select %2, %464, %465 : vector<8x128xi1>, vector<8x128xf32>
    %467 = vector.extract_strided_slice %466 {offsets = [0, 0], sizes = [8, 32], strides = [1, 1]} : vector<8x128xf32> to vector<8x32xf32>
    %468 = vector.extract_strided_slice %466 {offsets = [0, 32], sizes = [8, 32], strides = [1, 1]} : vector<8x128xf32> to vector<8x32xf32>
    %469 = vector.extract_strided_slice %466 {offsets = [0, 64], sizes = [8, 32], strides = [1, 1]} : vector<8x128xf32> to vector<8x32xf32>
    %470 = vector.extract_strided_slice %466 {offsets = [0, 96], sizes = [8, 32], strides = [1, 1]} : vector<8x128xf32> to vector<8x32xf32>
    %471 = arith.mulf %468, %445 : vector<8x32xf32>
    %472 = arith.mulf %467, %470 : vector<8x32xf32>
    %473 = arith.addf %471, %472 : vector<8x32xf32>
    %474 = math.tanh %473 : vector<8x32xf32>
    %475 = arith.mulf %469, %474 : vector<8x32xf32>
    %476 = arith.index_cast %c7_i32_153 : i32 to index
    %c0_160 = arith.constant 0 : index
    %c0_161 = arith.constant 0 : index
    %477 = vector.load %arg10[%476, %c0_160, %c0_161] : memref<8x8x32xf32, #tpu.memory_space<vmem>>, vector<1x8x32xf32>
    %478 = vector.shape_cast %477 : vector<1x8x32xf32> to vector<8x32xf32>
    %479 = vector.shape_cast %475 : vector<8x32xf32> to vector<1x8x32xf32>
    tpu.vector_store %arg10[%476, %c0_160, %c0_161], %479 {strides = array<i32>} : memref<8x8x32xf32, #tpu.memory_space<vmem>>, vector<1x8x32xf32>,
    %c8_i32_162 = arith.constant 8 : i32
    %c0_163 = arith.constant 0 : index
    %c0_164 = arith.constant 0 : index
    %480 = vector.load %arg6[%c0_163, %c0_164] : memref<1x32xf32, #tpu.memory_space<vmem>>, vector<1x32xf32>
    %c0_165 = arith.constant 0 : index
    %c0_166 = arith.constant 0 : index
    %c0_167 = arith.constant 0 : index
    %481 = vector.load %arg10[%c0_165, %c0_166, %c0_167] : memref<8x8x32xf32, #tpu.memory_space<vmem>>, vector<8x8x32xf32>
    %482 = vector.shape_cast %480 : vector<1x32xf32> to vector<1x1x32xf32>
    %483 = vector.broadcast %482 : vector<1x1x32xf32> to vector<8x8x32xf32>
    %484 = arith.mulf %481, %483 : vector<8x8x32xf32>
    %cst_168 = arith.constant dense<0.000000e+00> : vector<8x8xf32>
    %485 = vector.multi_reduction <add>, %484, %cst_168 [2] : vector<8x8x32xf32> to vector<8x8xf32>
    %c0_169 = arith.constant 0 : index
    %c0_170 = arith.constant 0 : index
    %486 = vector.load %arg7[%c0_169, %c0_170] : memref<1x1xf32, #tpu.memory_space<vmem>>, vector<1x1xf32>
    %487 = vector.extract %486[0, 0] : f32 from vector<1x1xf32>
    %488 = vector.broadcast %487 : f32 to vector<8x8xf32>
    %489 = arith.addf %485, %488 : vector<8x8xf32>
    %c0_171 = arith.constant 0 : index
    %c0_172 = arith.constant 0 : index
    %490 = vector.load %arg8[%c0_171, %c0_172] : memref<8x8xf32, #tpu.memory_space<vmem>>, vector<8x8xf32>
    tpu.vector_store %arg8[%c0_171, %c0_172], %489 {strides = array<i32>} : memref<8x8xf32, #tpu.memory_space<vmem>>, vector<8x8xf32>,
    return
  }
  func.func @transform_0(%arg0: i32) -> (i32, i32) {
    %c0_i32 = arith.constant 0 : i32
    %c0_i32_0 = arith.constant 0 : i32
    return %c0_i32, %arg0 : i32, i32
  }
  func.func @transform_1(%arg0: i32) -> (i32, i32) {
    %c0_i32 = arith.constant 0 : i32
    %c0_i32_0 = arith.constant 0 : i32
    %c0_i32_1 = arith.constant 0 : i32
    return %c0_i32, %c0_i32_0 : i32, i32
  }
  func.func @transform_2(%arg0: i32) -> (i32, i32, i32) {
    %c0_i32 = arith.constant 0 : i32
    %c0_i32_0 = arith.constant 0 : i32
    %c0_i32_1 = arith.constant 0 : i32
    %c0_i32_2 = arith.constant 0 : i32
    return %c0_i32, %c0_i32_0, %c0_i32_1 : i32, i32, i32
  }
  func.func @transform_3(%arg0: i32) -> (i32, i32, i32) {
    %c0_i32 = arith.constant 0 : i32
    %c0_i32_0 = arith.constant 0 : i32
    %c0_i32_1 = arith.constant 0 : i32
    %c0_i32_2 = arith.constant 0 : i32
    return %c0_i32, %c0_i32_0, %c0_i32_1 : i32, i32, i32
  }
  func.func @transform_4(%arg0: i32) -> (i32, i32, i32) {
    %c0_i32 = arith.constant 0 : i32
    %c0_i32_0 = arith.constant 0 : i32
    %c0_i32_1 = arith.constant 0 : i32
    %c0_i32_2 = arith.constant 0 : i32
    return %c0_i32, %c0_i32_0, %c0_i32_1 : i32, i32, i32
  }
  func.func @transform_5(%arg0: i32) -> (i32, i32) {
    %c0_i32 = arith.constant 0 : i32
    %c0_i32_0 = arith.constant 0 : i32
    %c0_i32_1 = arith.constant 0 : i32
    return %c0_i32, %c0_i32_0 : i32, i32
  }
  func.func @transform_6(%arg0: i32) -> (i32, i32) {
    %c0_i32 = arith.constant 0 : i32
    %c0_i32_0 = arith.constant 0 : i32
    %c0_i32_1 = arith.constant 0 : i32
    return %c0_i32, %c0_i32_0 : i32, i32
  }
  func.func @transform_7(%arg0: i32) -> (i32, i32) {
    %c0_i32 = arith.constant 0 : i32
    %c0_i32_0 = arith.constant 0 : i32
    return %c0_i32, %arg0 : i32, i32
  }
}

</mosaic_0001>

<bundles_post_ra>
// kernel: forecaster_forward.1
= control target key start
LH: loop header
LB: loop body
LE: loop exit
PB: predicated region body
PF: predicated region fallthrough
CT: control target
= control target key end

     0   :  { %s3190_s0 = inlined_call_operand.vmem [shape: f32[8,8], index: 0, kind: input, shape index: {}]   ;;  %s3191_s1 = inlined_call_operand.vmem [shape: f32[1,128], index: 1, kind: input, shape index: {}]   ;;  %s3192_s2 = inlined_call_operand.vmem [shape: f32[1,32,128], index: 2, kind: input, shape index: {}]   ;;  %s3193_s3 = inlined_call_operand.hbm [shape: f32[2,32,128], index: 3, kind: input, shape index: {}]   ;;  %s3194_s4 = inlined_call_operand.vmem [shape: f32[2,1,128], index: 4, kind: input, shape index: {}]   ;;  %s3195_s5 = inlined_call_operand.vmem [shape: f32[1,32], index: 5, kind: input, shape index: {}]   ;;  %s3196_s6 = inlined_call_operand.<no memory space> [shape: f32[1,1], index: 6, kind: input, shape index: {}]   ;;  %s3197_s7 = inlined_call_operand.vmem [shape: f32[8,8], index: 7, kind: output, shape index: {}]  }
   0x1   :  { %v12_v0 = vstv %s3196_s6 }
   0x2   :  { %13 = vst [vmem:[#allocation4] sm:$0x1] %v12_v0 }
   0x3   :  { %14 = vsyncpa [#allocation6], 0  ;;  %s2765_s26 = smov [#allocation5]   ;;  %s2741_s30 = scalar_lea.hbm %s3193_s3, 1024 }
   0x4   :  { %s26_s27 = sshll.u32 %s2765_s26, 4  ;;  %p2742_p0 = scmp.ne.s32.totalorder %s3193_s3, %s2741_s30  ;;  %s27_s27 = int_to_ptr.vmem [resolvable:$true] %s26_s27 }
   0x5   :  { %p2745_p1 = scmp.lt.u32.totalorder %s2741_s30, %s3193_s3 }
   0x7   :  { %p2747_p2 = pnand %p2745_p1, %p2742_p0 }
   0x9   :  { %2750 = shalt.err (!%p2747_p2)
}
   0xa   :  { %s2751_s6 = scalar_lea.vmem %s27_s27, 1024  ;;  %p2756_p4 = scmp.lt.s32.totalorder %s27_s27, %s27_s27 }
   0xb   :  { %p2752_p3 = scmp.ne.s32.totalorder %s27_s27, %s2751_s6  ;;  %p2757_p5 = scmp.lt.s32.totalorder %s2751_s6, %s2751_s6 }
   0xd   :  { %p2758_p6 = por %p2757_p5, %p2756_p4 }
   0xf   :  { %p2759_p7 = pnand %p2758_p6, %p2752_p3 }
  0x11   :  { %2762 = shalt.err (!%p2759_p7)
}
  0x12   :  { %s2766_s12 = smov 128   ;;  %s2767_s13 = smov 8  }
  0x13   :  { %32 = dma.hbm_to_vmem [thread:$0]  %s3193_s3, 1024, %s27_s27, [#allocation6], %s2766_s12, %s2766_s12, %s2767_s13  }
  0x14   :  { %2763 = dma.done.wait [#allocation6], 1024  }
  0x15   :  { %2764 = vsyncadd [#allocation6], 4294966272  ;;  %v42_v1 = vlaneseq  ;;  %v2768_v2 = vmov 0.0|0.0   ;;  %vm2769_vm0 = vmmov 0   ;;  %v2770_v3 = vmov 0.0   ;;  %v141_v6 = vld [vmem:[#allocation5] sm:$0xff] }
  0x16   :  { %2499 = vmatprep.subr.bf16.mxu0 %v2768_v2  ;;  %2311 = vmatprep.mubr.msk.f32.mxu0 %vm2769_vm0, %v2770_v3  ;;  %v142_v7 = vld [vmem:[#allocation5 + $0x8] sm:$0xff]  ;;  %v143_v8 = vld [vmem:[#allocation5 + $0x10] sm:$0xff]  ;;  %v144_v10 = vld [vmem:[#allocation5 + $0x18] sm:$0xff]  ;;  %s2772_s20 = smov 64   ;;  %vm145_vm2 = vcmask 261120   ;;  %vm2146_vm3 = vcmask 1041409  }
  0x17   :  { %v2831_v4 = vshrl.u32 %v42_v1, 7  ;;  %2505 = vmatprep.subr.bf16.mxu1 %v2768_v2  ;;  %2322 = vmatprep.mubr.msk.f32.mxu1 %vm2769_vm0, %v2770_v3  ;;  %v2837_v9 = vpack.c.bf16 %v142_v7, %v141_v6  ;;  %v2842_v11 = vld [vmem:[%s3190_s0] sm:$0xff]  ;;  %v2846_v13 = vpack.c.bf16 %v144_v10, %v143_v8  ;;  %v2874_v25 = vand.u32 127, %v42_v1 }
  0x18   :  { %v2865_v14 = vld [vmem:[%s3191_s1] ss:$0 sm:$0xff]  ;;  %s2771_s1 = smov 32   ;;  %vm2148_vm4 = vcmask 1042434   ;;  %vm2150_vm5 = vcmask 1043459   ;;  %vm2152_vm6 = vcmask 1044484  }
  0x19   :  { %v48_v5 = vsub.s32 0, %v2831_v4  ;;  %2501 = vmatpush3.bf16.msra.mxu0 %v2837_v9  ;;  %2507 = vmatpush3.bf16.msra.mxu1 %v2837_v9  ;;  %v2871_v17 = vld [vmem:[%s3194_s4] ss:$0 sm:$0xff]  ;;  %vm44_vm1 = vcmp.lt.s32.totalorder %v2874_v25, 96  ;;  %v55_v35 = vsub.s32 1, %v2831_v4  ;;  %v62_v58 = vsub.s32 2, %v2831_v4 }
  0x1a   :  { %2502 = vmatprep.subr.bf16.mxu0 %v2768_v2  ;;  %2508 = vmatprep.subr.bf16.mxu1 %v2768_v2  ;;  %vm2154_vm7 = vcmask 1045509   ;;  %vm2156_vm8 = vcmask 1046534   ;;  %vm2158_vm9 = vcmask 1047559   ;;  %vm2161_vm10 = vcmask 64512  }
  0x1b   :  { %v49_v12 = vrot.slane %v2842_v11, %v48_v5  ;;  %v56_v36 = vrot.slane %v2842_v11, %v55_v35  ;;  %v63_v59 = vrot.slane %v2842_v11, %v62_v58 }
  0x1d   :  { %51 = vbcast.lane.b32.xlu0 %v49_v12, 256  ;;  %2504 = vmatpush3.bf16.msra.mxu0 %v2846_v13 }
  0x1e   :  { %2510 = vmatpush3.bf16.msra.mxu1 %v2846_v13  ;;  %2511 = vmatprep.subr.bf16.mxu0 %v2768_v2 }
  0x1f   :  { %2517 = vmatprep.subr.bf16.mxu1 %v2768_v2 }
  0x20   :  { %2312 = vmatmul.mubr.f32.vlgmr.msra.gmra.mrb[0].mxu0 %v2770_v3 }
  0x21   :  { %2513 = vmatpush3.bf16.msra.mxu0 %v2837_v9  ;;  %2333 = vmatprep.mubr.msk.f32.mxu0 %vm2769_vm0, %v2770_v3 }
  0x22   :  { %2514 = vmatprep.subr.bf16.mxu0 %v2768_v2 }
  0x25   :  { %2516 = vmatpush3.bf16.msra.mxu0 %v2846_v13 }
  0x26   :  { %2523 = vmatprep.subr.bf16.mxu0 %v2768_v2 }
  0x8f   :  { %v52_v15 = vpop.permute.xlu0 %51 }
  0x90   :  { %v109_v16 = vmul.f32 %v2865_v14, %v52_v15 }
  0x92   :  { %v124_v18 = vadd.f32 %v2871_v17, %v109_v16 }
  0xf3   :  { %v215_v19 = vpop.f32.mrb[0].mxu0 }
  0xf4   :  { %v219_v20 = vadd.f32 %v215_v19, %v124_v18  ;;  %v2313_v21 = vpop.f32.mrb[1].mxu0 }
  0xf6   :  { %v2170_v22 = vmul.f32 -1.442695, %v219_v20 }
  0xf8   :  { %2613 = vpow2.f32 %v2170_v22 }
  0xf9   :  { %2615 = vtanh.f32 %v219_v20 }
 0x102   :  { %v2614_v23 = vpop.eup %2613 }
 0x103   :  { %v223_v24 = vadd.f32 1.0, %v2614_v23  ;;  %v2616_v26 = vpop.eup %2615 }
 0x105   :  { %2617 = vrcp.f32 %v223_v24 }
 0x10f   :  { %v2618_v27 = vpop.eup %2617 }
 0x110   :  { %v227_v28 = vsel %vm44_vm1, %v2618_v27, %v2616_v26  ;;  %v69_v26 = vsub.s32 3, %v2831_v4 }
 0x111   :  { %230 = vrot.lane.b32.xlu0 %v227_v28, %s2771_s1  ;;  %v228_v31 = vmul.f32 0.0, %v227_v28 }
 0x112   :  { %v70_v27 = vrot.slane %v2842_v11, %v69_v26 }
 0x183   :  { %v231_v29 = vpop.permute.xlu0 %230 }
 0x184   :  { %v233_v30 = vmul.f32 %v231_v29, %v227_v28 }
 0x186   :  { %235 = vrot.lane.b32.xlu1 %v233_v30, %s2771_s1 }
 0x1f8   :  { %v236_v32 = vpop.permute.xlu1 %235 }
 0x1f9   :  { %v238_v33 = vadd.f32 %v236_v32, %v228_v31 }
 0x1fb   :  { %2619 = vtanh.f32 %v238_v33 }
 0x205   :  { %v2620_v34 = vpop.eup %2619 }
 0x206   :  { %241 = vrot.lane.b32.xlu1 %v2620_v34, %s2771_s1 }
 0x20a   :  { %58 = vbcast.lane.b32.xlu1 %v56_v36, 256 }
 0x278   :  { %v242_v37 = vpop.permute.xlu1 %241 }
 0x279   :  { %v244_v38 = vmul.f32 %v242_v37, %v227_v28 }
 0x27b   :  { %246 = vrot.lane.b32.xlu0 %v244_v38, %s2772_s20 }
 0x27c   :  { %v59_v40 = vpop.permute.xlu1 %58 }
 0x27d   :  { %v110_v41 = vmul.f32 %v2865_v14, %v59_v40 }
 0x27f   :  { %v125_v42 = vadd.f32 %v2871_v17, %v110_v41 }
 0x2ed   :  { %v247_v39 = vpop.permute.xlu0 %246 }
 0x2ee   :  { %249 = vst.msk [vmem:[#allocation3] sm:$0xff] %vm145_vm2, %v247_v39  ;;  %2323 = vmatmul.mubr.msk.f32.vlgmr.msra.gmra.mrb[0].mxu1 %vm145_vm2, %v247_v39 }
 0x2ef   :  { %2519 = vmatpush3.bf16.msra.mxu1 %v2837_v9  ;;  %2344 = vmatprep.mubr.msk.f32.mxu1 %vm2769_vm0, %v2770_v3 }
 0x2f0   :  { %2520 = vmatprep.subr.bf16.mxu1 %v2768_v2 }
 0x2f3   :  { %2522 = vmatpush3.bf16.msra.mxu1 %v2846_v13 }
 0x2f4   :  { %2529 = vmatprep.subr.bf16.mxu1 %v2768_v2 }
 0x3c1   :  { %v324_v43 = vpop.f32.mrb[0].mxu1 }
 0x3c2   :  { %v328_v44 = vadd.f32 %v324_v43, %v125_v42  ;;  %v2324_v45 = vpop.f32.mrb[1].mxu1 }
 0x3c4   :  { %v2172_v46 = vmul.f32 -1.442695, %v328_v44 }
 0x3c6   :  { %2621 = vpow2.f32 %v2172_v46 }
 0x3c7   :  { %2623 = vtanh.f32 %v328_v44 }
 0x3d0   :  { %v2622_v47 = vpop.eup %2621 }
 0x3d1   :  { %v332_v48 = vadd.f32 1.0, %v2622_v47  ;;  %v2624_v49 = vpop.eup %2623 }
 0x3d3   :  { %2625 = vrcp.f32 %v332_v48 }
 0x3dd   :  { %v2626_v50 = vpop.eup %2625 }
 0x3de   :  { %v336_v51 = vsel %vm44_vm1, %v2626_v50, %v2624_v49  ;;  %v76_v49 = vsub.s32 4, %v2831_v4 }
 0x3df   :  { %339 = vrot.lane.b32.xlu0 %v336_v51, %s2771_s1  ;;  %v337_v54 = vmul.f32 %v336_v51, %v238_v33 }
 0x3e0   :  { %v77_v50 = vrot.slane %v2842_v11, %v76_v49  ;;  %v1020_v49 = vld [vmem:[#allocation3] sm:$0xff] }
 0x451   :  { %v340_v52 = vpop.permute.xlu0 %339 }
 0x452   :  { %v342_v53 = vmul.f32 %v340_v52, %v336_v51 }
 0x454   :  { %344 = vrot.lane.b32.xlu1 %v342_v53, %s2771_s1 }
 0x4c6   :  { %v345_v55 = vpop.permute.xlu1 %344 }
 0x4c7   :  { %v347_v56 = vadd.f32 %v345_v55, %v337_v54 }
 0x4c9   :  { %2627 = vtanh.f32 %v347_v56 }
 0x4d3   :  { %v2628_v57 = vpop.eup %2627 }
 0x4d4   :  { %350 = vrot.lane.b32.xlu0 %v2628_v57, %s2771_s1 }
 0x4d8   :  { %65 = vbcast.lane.b32.xlu0 %v63_v59, 256 }
 0x546   :  { %v351_v60 = vpop.permute.xlu0 %350 }
 0x547   :  { %v353_v61 = vmul.f32 %v351_v60, %v336_v51 }
 0x549   :  { %355 = vrot.lane.b32.xlu1 %v353_v61, %s2772_s20 }
 0x54a   :  { %v66_v63 = vpop.permute.xlu0 %65 }
 0x54b   :  { %v111_v0 = vmul.f32 %v2865_v14, %v66_v63 }
 0x54d   :  { %v126_v1 = vadd.f32 %v2871_v17, %v111_v0 }
 0x5bb   :  { %v356_v62 = vpop.permute.xlu1 %355 }
 0x5bc   :  { %359 = vst.msk [vmem:[#allocation3 + $0x8] sm:$0xff] %vm145_vm2, %v356_v62  ;;  %2334 = vmatmul.mubr.msk.f32.vlgmr.msra.gmra.mrb[2].mxu0 %vm145_vm2, %v356_v62 }
 0x5bd   :  { %2525 = vmatpush3.bf16.msra.mxu0 %v2837_v9  ;;  %2355 = vmatprep.mubr.msk.f32.mxu0 %vm2769_vm0, %v2770_v3 }
 0x5be   :  { %2526 = vmatprep.subr.bf16.mxu0 %v2768_v2 }
 0x5c1   :  { %2528 = vmatpush3.bf16.msra.mxu0 %v2846_v13 }
 0x5c2   :  { %2535 = vmatprep.subr.bf16.mxu0 %v2768_v2 }
 0x68f   :  { %v434_v5 = vpop.f32.mrb[2].mxu0 }
 0x690   :  { %v438_v6 = vadd.f32 %v434_v5, %v126_v1  ;;  %v2335_v7 = vpop.f32.mrb[3].mxu0 }
 0x692   :  { %v2174_v8 = vmul.f32 -1.442695, %v438_v6 }
 0x694   :  { %2629 = vpow2.f32 %v2174_v8 }
 0x695   :  { %2631 = vtanh.f32 %v438_v6 }
 0x69e   :  { %v2630_v10 = vpop.eup %2629 }
 0x69f   :  { %v442_v12 = vadd.f32 1.0, %v2630_v10  ;;  %v2632_v15 = vpop.eup %2631 }
 0x6a1   :  { %2633 = vrcp.f32 %v442_v12 }
 0x6ab   :  { %v2634_v16 = vpop.eup %2633 }
 0x6ac   :  { %v446_v18 = vsel %vm44_vm1, %v2634_v16, %v2632_v15  ;;  %v83_v15 = vsub.s32 5, %v2831_v4 }
 0x6ad   :  { %449 = vrot.lane.b32.xlu1 %v446_v18, %s2771_s1  ;;  %v447_v21 = vmul.f32 %v446_v18, %v347_v56 }
 0x6ae   :  { %v84_v16 = vrot.slane %v2842_v11, %v83_v15 }
 0x71f   :  { %v450_v19 = vpop.permute.xlu1 %449 }
 0x720   :  { %v452_v20 = vmul.f32 %v450_v19, %v446_v18 }
 0x722   :  { %454 = vrot.lane.b32.xlu0 %v452_v20, %s2771_s1 }
 0x794   :  { %v455_v22 = vpop.permute.xlu0 %454 }
 0x795   :  { %v457_v23 = vadd.f32 %v455_v22, %v447_v21 }
 0x797   :  { %2635 = vtanh.f32 %v457_v23 }
 0x7a1   :  { %v2636_v24 = vpop.eup %2635 }
 0x7a2   :  { %460 = vrot.lane.b32.xlu1 %v2636_v24, %s2771_s1 }
 0x7a6   :  { %72 = vbcast.lane.b32.xlu1 %v70_v27, 256 }
 0x814   :  { %v461_v28 = vpop.permute.xlu1 %460 }
 0x815   :  { %v463_v29 = vmul.f32 %v461_v28, %v446_v18 }
 0x817   :  { %465 = vrot.lane.b32.xlu0 %v463_v29, %s2772_s20 }
 0x818   :  { %v73_v31 = vpop.permute.xlu1 %72 }
 0x819   :  { %v112_v32 = vmul.f32 %v2865_v14, %v73_v31 }
 0x81b   :  { %v127_v33 = vadd.f32 %v2871_v17, %v112_v32 }
 0x889   :  { %v466_v30 = vpop.permute.xlu0 %465 }
 0x88a   :  { %469 = vst.msk [vmem:[#allocation3 + $0x10] sm:$0xff] %vm145_vm2, %v466_v30  ;;  %2345 = vmatmul.mubr.msk.f32.vlgmr.msra.gmra.mrb[2].mxu1 %vm145_vm2, %v466_v30 }
 0x88b   :  { %2531 = vmatpush3.bf16.msra.mxu1 %v2837_v9  ;;  %2366 = vmatprep.mubr.msk.f32.mxu1 %vm2769_vm0, %v2770_v3 }
 0x88c   :  { %2532 = vmatprep.subr.bf16.mxu1 %v2768_v2 }
 0x88f   :  { %2534 = vmatpush3.bf16.msra.mxu1 %v2846_v13 }
 0x890   :  { %2541 = vmatprep.subr.bf16.mxu1 %v2768_v2 }
 0x95d   :  { %v544_v34 = vpop.f32.mrb[2].mxu1 }
 0x95e   :  { %v548_v35 = vadd.f32 %v544_v34, %v127_v33  ;;  %v2346_v36 = vpop.f32.mrb[3].mxu1 }
 0x960   :  { %v2176_v37 = vmul.f32 -1.442695, %v548_v35 }
 0x962   :  { %2637 = vpow2.f32 %v2176_v37  ;;  %v1028_v37 = vld [vmem:[%s3192_s2] sm:$0xff] }
 0x963   :  { %2639 = vtanh.f32 %v548_v35 }
 0x96c   :  { %v2638_v38 = vpop.eup %2637 }
 0x96d   :  { %v552_v39 = vadd.f32 1.0, %v2638_v38  ;;  %v2640_v40 = vpop.eup %2639  ;;  %v1029_v38 = vld [vmem:[%s3192_s2 + $0x8] sm:$0xff] }
 0x96f   :  { %2641 = vrcp.f32 %v552_v39  ;;  %v2547_v39 = vpack.c.bf16 %v1029_v38, %v1028_v37 }
 0x979   :  { %v2642_v41 = vpop.eup %2641 }
 0x97a   :  { %v556_v42 = vsel %vm44_vm1, %v2642_v41, %v2640_v40 }
 0x97b   :  { %559 = vrot.lane.b32.xlu0 %v556_v42, %s2771_s1  ;;  %v557_v45 = vmul.f32 %v556_v42, %v457_v23 }
 0x9ed   :  { %v560_v43 = vpop.permute.xlu0 %559 }
 0x9ee   :  { %v562_v44 = vmul.f32 %v560_v43, %v556_v42  ;;  %v90_v43 = vsub.s32 6, %v2831_v4 }
 0x9f0   :  { %564 = vrot.lane.b32.xlu1 %v562_v44, %s2771_s1  ;;  %v91_v44 = vrot.slane %v2842_v11, %v90_v43 }
 0xa62   :  { %v565_v46 = vpop.permute.xlu1 %564 }
 0xa63   :  { %v567_v47 = vadd.f32 %v565_v46, %v557_v45  ;;  %v1030_v45 = vld [vmem:[%s3192_s2 + $0x10] sm:$0xff]  ;;  %v1031_v46 = vld [vmem:[%s3192_s2 + $0x18] sm:$0xff] }
 0xa65   :  { %2643 = vtanh.f32 %v567_v47 }
 0xa6f   :  { %v2644_v48 = vpop.eup %2643 }
 0xa70   :  { %570 = vrot.lane.b32.xlu0 %v2644_v48, %s2771_s1 }
 0xa74   :  { %79 = vbcast.lane.b32.xlu0 %v77_v50, 256  ;;  %v1021_v50 = vld [vmem:[#allocation3 + $0x8] sm:$0xff] }
 0xae2   :  { %v571_v51 = vpop.permute.xlu0 %570 }
 0xae3   :  { %v573_v52 = vmul.f32 %v571_v51, %v556_v42  ;;  %v1022_v51 = vld [vmem:[#allocation3 + $0x10] sm:$0xff] }
 0xae5   :  { %575 = vrot.lane.b32.xlu1 %v573_v52, %s2772_s20 }
 0xae6   :  { %v80_v54 = vpop.permute.xlu0 %79 }
 0xae7   :  { %v113_v55 = vmul.f32 %v2865_v14, %v80_v54 }
 0xae9   :  { %v128_v56 = vadd.f32 %v2871_v17, %v113_v55 }
 0xb57   :  { %v576_v53 = vpop.permute.xlu1 %575 }
 0xb58   :  { %579 = vst.msk [vmem:[#allocation3 + $0x18] sm:$0xff] %vm145_vm2, %v576_v53  ;;  %2356 = vmatmul.mubr.msk.f32.vlgmr.msra.gmra.mrb[4].mxu0 %vm145_vm2, %v576_v53 }
 0xb59   :  { %2537 = vmatpush3.bf16.msra.mxu0 %v2837_v9  ;;  %2377 = vmatprep.mubr.msk.f32.mxu0 %vm2769_vm0, %v2770_v3 }
 0xb5a   :  { %2538 = vmatprep.subr.bf16.mxu0 %v2768_v2 }
 0xb5d   :  { %2540 = vmatpush3.bf16.msra.mxu0 %v2846_v13 }
 0xb5e   :  { %2548 = vmatprep.subr.bf16.mxu0 %v2547_v39 }
 0xb5f   :  { %v1023_v52 = vld [vmem:[#allocation3 + $0x18] sm:$0xff] }
 0xc2b   :  { %v654_v57 = vpop.f32.mrb[4].mxu0 }
 0xc2c   :  { %v658_v58 = vadd.f32 %v654_v57, %v128_v56  ;;  %v2357_v59 = vpop.f32.mrb[5].mxu0 }
 0xc2e   :  { %v2178_v60 = vmul.f32 -1.442695, %v658_v58 }
 0xc30   :  { %2645 = vpow2.f32 %v2178_v60 }
 0xc31   :  { %2647 = vtanh.f32 %v658_v58 }
 0xc3a   :  { %v2646_v61 = vpop.eup %2645 }
 0xc3b   :  { %v662_v62 = vadd.f32 1.0, %v2646_v61  ;;  %v2648_v63 = vpop.eup %2647 }
 0xc3d   :  { %2649 = vrcp.f32 %v662_v62 }
 0xc47   :  { %v2650_v0 = vpop.eup %2649 }
 0xc48   :  { %v666_v1 = vsel %vm44_vm1, %v2650_v0, %v2648_v63 }
 0xc49   :  { %669 = vrot.lane.b32.xlu1 %v666_v1, %s2771_s1  ;;  %v667_v7 = vmul.f32 %v666_v1, %v567_v47  ;;  %v2551_v47 = vpack.c.bf16 %v1031_v46, %v1030_v45 }
 0xcbb   :  { %v670_v5 = vpop.permute.xlu1 %669 }
 0xcbc   :  { %v672_v6 = vmul.f32 %v670_v5, %v666_v1 }
 0xcbe   :  { %674 = vrot.lane.b32.xlu0 %v672_v6, %s2771_s1 }
 0xd30   :  { %v675_v8 = vpop.permute.xlu0 %674 }
 0xd31   :  { %v677_v10 = vadd.f32 %v675_v8, %v667_v7 }
 0xd33   :  { %2651 = vtanh.f32 %v677_v10 }
 0xd3d   :  { %v2652_v12 = vpop.eup %2651 }
 0xd3e   :  { %680 = vrot.lane.b32.xlu1 %v2652_v12, %s2771_s1 }
 0xd42   :  { %86 = vbcast.lane.b32.xlu1 %v84_v16, 256 }
 0xdb0   :  { %v681_v18 = vpop.permute.xlu1 %680 }
 0xdb1   :  { %v683_v19 = vmul.f32 %v681_v18, %v666_v1 }
 0xdb3   :  { %685 = vrot.lane.b32.xlu0 %v683_v19, %s2772_s20 }
 0xdb4   :  { %v87_v21 = vpop.permute.xlu1 %86 }
 0xdb5   :  { %v114_v22 = vmul.f32 %v2865_v14, %v87_v21 }
 0xdb7   :  { %v129_v23 = vadd.f32 %v2871_v17, %v114_v22 }
 0xe25   :  { %v686_v20 = vpop.permute.xlu0 %685 }
 0xe26   :  { %689 = vst.msk [vmem:[#allocation3 + $0x20] sm:$0xff] %vm145_vm2, %v686_v20  ;;  %2367 = vmatmul.mubr.msk.f32.vlgmr.msra.gmra.mrb[4].mxu1 %vm145_vm2, %v686_v20 }
 0xe27   :  { %2543 = vmatpush3.bf16.msra.mxu1 %v2837_v9  ;;  %2388 = vmatprep.mubr.msk.f32.mxu1 %vm2769_vm0, %v2770_v3 }
 0xe28   :  { %2544 = vmatprep.subr.bf16.mxu1 %v2768_v2 }
 0xe2b   :  { %2546 = vmatpush3.bf16.msra.mxu1 %v2846_v13 }
 0xe2c   :  { %2555 = vmatprep.subr.bf16.mxu1 %v2768_v2 }
 0xe2d   :  { %v1024_v53 = vld [vmem:[#allocation3 + $0x20] sm:$0xff] }
 0xef9   :  { %v764_v24 = vpop.f32.mrb[4].mxu1 }
 0xefa   :  { %v768_v26 = vadd.f32 %v764_v24, %v129_v23  ;;  %v2368_v27 = vpop.f32.mrb[5].mxu1  ;;  %v1187_v23 = vld [vmem:[#allocation5 + $0x20] sm:$0xff]  ;;  %v1188_v24 = vld [vmem:[#allocation5 + $0x28] sm:$0xff] }
 0xefb   :  { %v1189_v27 = vld [vmem:[#allocation5 + $0x30] sm:$0xff] }
 0xefc   :  { %v2180_v28 = vmul.f32 -1.442695, %v768_v26 }
 0xefe   :  { %2653 = vpow2.f32 %v2180_v28  ;;  %v1190_v28 = vld [vmem:[#allocation5 + $0x38] sm:$0xff] }
 0xeff   :  { %2655 = vtanh.f32 %v768_v26  ;;  %v3015_v26 = vpack.c.bf16 %v1188_v24, %v1187_v23 }
 0xf08   :  { %v2654_v9 = vpop.eup %2653 }
 0xf09   :  { %v772_v29 = vadd.f32 1.0, %v2654_v9  ;;  %v2656_v30 = vpop.eup %2655  ;;  %v3019_v9 = vpack.c.bf16 %v1190_v28, %v1189_v27 }
 0xf0b   :  { %2657 = vrcp.f32 %v772_v29 }
 0xf15   :  { %v2658_v31 = vpop.eup %2657 }
 0xf16   :  { %v776_v13 = vsel %vm44_vm1, %v2658_v31, %v2656_v30 }
 0xf17   :  { %779 = vrot.lane.b32.xlu0 %v776_v13, %s2771_s1  ;;  %v777_v34 = vmul.f32 %v776_v13, %v677_v10 }
 0xf89   :  { %v780_v32 = vpop.permute.xlu0 %779 }
 0xf8a   :  { %v782_v33 = vmul.f32 %v780_v32, %v776_v13 }
 0xf8c   :  { %784 = vrot.lane.b32.xlu1 %v782_v33, %s2771_s1 }
 0xffe   :  { %v785_v35 = vpop.permute.xlu1 %784 }
 0xfff   :  { %v787_v36 = vadd.f32 %v785_v35, %v777_v34  ;;  %v3043_v34 = vld [vmem:[%s3194_s4 + $0x1] ss:$0 sm:$0xff] }
0x1001   :  { %2659 = vtanh.f32 %v787_v36 }
0x100b   :  { %v2660_v40 = vpop.eup %2659 }
0x100c   :  { %790 = vrot.lane.b32.xlu0 %v2660_v40, %s2771_s1 }
0x1010   :  { %93 = vbcast.lane.b32.xlu0 %v91_v44, 256 }
0x107e   :  { %v791_v41 = vpop.permute.xlu0 %790 }
0x107f   :  { %v793_v42 = vmul.f32 %v791_v41, %v776_v13 }
0x1081   :  { %795 = vrot.lane.b32.xlu1 %v793_v42, %s2772_s20 }
0x1082   :  { %v94_v55 = vpop.permute.xlu0 %93 }
0x1083   :  { %v115_v56 = vmul.f32 %v2865_v14, %v94_v55 }
0x1085   :  { %v130_v57 = vadd.f32 %v2871_v17, %v115_v56 }
0x10f3   :  { %v796_v48 = vpop.permute.xlu1 %795 }
0x10f4   :  { %799 = vst.msk [vmem:[#allocation3 + $0x28] sm:$0xff] %vm145_vm2, %v796_v48  ;;  %2378 = vmatmul.mubr.msk.f32.vlgmr.msra.gmra.mrb[6].mxu0 %vm145_vm2, %v796_v48 }
0x10f5   :  { %2550 = vmatpush3.bf16.msra.mxu0 %v2547_v39  ;;  %2399 = vmatprep.mubr.msk.f32.mxu0 %vm145_vm2, %v1020_v49 }
0x10f6   :  { %2552 = vmatprep.subr.bf16.mxu0 %v2551_v47 }
0x10f9   :  { %2554 = vmatpush3.bf16.msra.mxu0 %v2551_v47 }
0x10fa   :  { %2567 = vmatprep.subr.bf16.mxu0 %v2768_v2 }
0x10fb   :  { %v1025_v54 = vld [vmem:[#allocation3 + $0x28] sm:$0xff] }
0x10fc   :  { %2400 = vmatmul.mubr.msk.f32.vlgmr.msra.gmra.mrb[8].mxu0 %vm145_vm2, %v1021_v50  ;;  %v97_v50 = vsub.s32 7, %v2831_v4 }
0x10fd   :  { %2402 = vmatprep.mubr.msk.f32.mxu0 %vm145_vm2, %v1022_v51  ;;  %2569 = vmatpush3.bf16.msra.mxu0 %v3015_v26 }
0x10fe   :  { %2570 = vmatprep.subr.bf16.mxu0 %v2768_v2 }
0x1100   :  { %2403 = vmatmul.mubr.msk.f32.gmra.mrb[10].mxu0 %vm145_vm2, %v1023_v52  ;;  %v98_v52 = vrot.slane %v2842_v11, %v97_v50 }
0x1101   :  { %2405 = vmatprep.mubr.msk.f32.mxu0 %vm145_vm2, %v1024_v53  ;;  %2572 = vmatpush3.bf16.msra.mxu0 %v3019_v9 }
0x1102   :  { %2579 = vmatprep.subr.bf16.mxu0 %v2768_v2 }
0x1104   :  { %2406 = vmatmul.mubr.msk.f32.gmra.mrb[12].mxu0 %vm145_vm2, %v1025_v54 }
0x11c7   :  { %v874_v58 = vpop.f32.mrb[6].mxu0 }
0x11c8   :  { %v878_v59 = vadd.f32 %v874_v58, %v130_v57  ;;  %v2379_v60 = vpop.f32.mrb[7].mxu0 }
0x11ca   :  { %v2182_v61 = vmul.f32 -1.442695, %v878_v59 }
0x11cc   :  { %2661 = vpow2.f32 %v2182_v61 }
0x11cd   :  { %2663 = vtanh.f32 %v878_v59 }
0x11cf   :  { %v2997_v62 = vpop.f32.mrb[8].mxu0 }
0x11d0   :  { %v1122_v63 = vpop.f32.mrb[9].mxu0 }
0x11d1   :  { %v1169_v35 = vadd.f32 %v3043_v34, %v1122_v63 }
0x11d3   :  { %v2999_v0 = vpop.f32.mrb[10].mxu0 }
0x11d4   :  { %v3001_v1 = vpop.f32.mrb[11].mxu0 }
0x11d6   :  { %v2662_v5 = vpop.eup %2661 }
0x11d7   :  { %v882_v6 = vadd.f32 1.0, %v2662_v5  ;;  %v3003_v7 = vpop.f32.mrb[12].mxu0  ;;  %v2664_v10 = vpop.eup %2663 }
0x11d8   :  { %v3005_v8 = vpop.f32.mrb[13].mxu0 }
0x11d9   :  { %2665 = vrcp.f32 %v882_v6 }
0x11e3   :  { %v2666_v12 = vpop.eup %2665 }
0x11e4   :  { %v886_v15 = vsel %vm44_vm1, %v2666_v12, %v2664_v10 }
0x11e5   :  { %889 = vrot.lane.b32.xlu1 %v886_v15, %s2771_s1  ;;  %v887_v19 = vmul.f32 %v886_v15, %v787_v36 }
0x1257   :  { %v890_v16 = vpop.permute.xlu1 %889 }
0x1258   :  { %v892_v18 = vmul.f32 %v890_v16, %v886_v15 }
0x125a   :  { %894 = vrot.lane.b32.xlu0 %v892_v18, %s2771_s1  ;;  %v1170_v18 = vadd.f32 %v2997_v62, %v3043_v34 }
0x12cc   :  { %v895_v20 = vpop.permute.xlu0 %894 }
0x12cd   :  { %v3011_v21 = vadd.f32 %v895_v20, %v887_v19 }
0x12cf   :  { %2667 = vtanh.f32 %v3011_v21 }
0x12d9   :  { %v2668_v22 = vpop.eup %2667 }
0x12da   :  { %900 = vrot.lane.b32.xlu1 %v2668_v22, %s2771_s1 }
0x134c   :  { %v901_v29 = vpop.permute.xlu1 %900 }
0x134d   :  { %v903_v30 = vmul.f32 %v901_v29, %v886_v15 }
0x134f   :  { %905 = vrot.lane.b32.xlu0 %v903_v30, %s2772_s20 }
0x13c1   :  { %v906_v31 = vpop.permute.xlu0 %905 }
0x13c2   :  { %909 = vst.msk [vmem:[#allocation3 + $0x30] sm:$0xff] %vm145_vm2, %v906_v31  ;;  %2389 = vmatmul.mubr.msk.f32.vlgmr.msra.gmra.mrb[6].mxu1 %vm145_vm2, %v906_v31 }
0x13c3   :  { %2557 = vmatpush3.bf16.msra.mxu1 %v3015_v26  ;;  %2419 = vmatprep.mubr.msk.f32.mxu1 %vm2769_vm0, %v2770_v3 }
0x13c4   :  { %2558 = vmatprep.subr.bf16.mxu1 %v2768_v2 }
0x13c7   :  { %2560 = vmatpush3.bf16.msra.mxu1 %v3019_v9 }
0x13c8   :  { %2561 = vmatprep.subr.bf16.mxu1 %v2768_v2 }
0x13c9   :  { %v1026_v13 = vld [vmem:[#allocation3 + $0x30] sm:$0xff] }
0x13ca   :  { %2420 = vmatmul.mubr.f32.vlgmr.msra.gmra.mrb[8].mxu1 %v2770_v3  ;;  %2408 = vmatprep.mubr.msk.f32.mxu0 %vm145_vm2, %v1026_v13 }
0x13cb   :  { %2563 = vmatpush3.bf16.msra.mxu1 %v3015_v26  ;;  %2430 = vmatprep.mubr.msk.f32.mxu1 %vm2769_vm0, %v2770_v3 }
0x13cc   :  { %2564 = vmatprep.subr.bf16.mxu1 %v2768_v2 }
0x13cf   :  { %2566 = vmatpush3.bf16.msra.mxu1 %v3019_v9 }
0x13d0   :  { %2573 = vmatprep.subr.bf16.mxu1 %v2768_v2 }
0x1495   :  { %v984_v32 = vpop.f32.mrb[6].mxu1 }
0x1496   :  { %v2390_v33 = vpop.f32.mrb[7].mxu1 }
0x149d   :  { %v1257_v36 = vpop.f32.mrb[8].mxu1 }
0x149e   :  { %v1261_v37 = vadd.f32 %v1257_v36, %v1169_v35  ;;  %v2421_v38 = vpop.f32.mrb[9].mxu1 }
0x14a0   :  { %v2195_v39 = vmul.f32 -1.442695, %v1261_v37 }
0x14a2   :  { %2669 = vpow2.f32 %v2195_v39 }
0x14a3   :  { %2671 = vtanh.f32 %v1261_v37 }
0x14ac   :  { %v2670_v40 = vpop.eup %2669 }
0x14ad   :  { %v1265_v41 = vadd.f32 1.0, %v2670_v40  ;;  %v2672_v42 = vpop.eup %2671 }
0x14af   :  { %2673 = vrcp.f32 %v1265_v41 }
0x14b9   :  { %v2674_v43 = vpop.eup %2673 }
0x14ba   :  { %v1269_v44 = vsel %vm44_vm1, %v2674_v43, %v2672_v42 }
0x14bb   :  { %1272 = vrot.lane.b32.xlu1 %v1269_v44, %s2771_s1  ;;  %v1270_v47 = vmul.f32 0.0, %v1269_v44 }
0x152d   :  { %v1273_v45 = vpop.permute.xlu1 %1272 }
0x152e   :  { %v1275_v46 = vmul.f32 %v1273_v45, %v1269_v44 }
0x1530   :  { %1277 = vrot.lane.b32.xlu0 %v1275_v46, %s2771_s1 }
0x15a2   :  { %v1278_v48 = vpop.permute.xlu0 %1277 }
0x15a3   :  { %v3050_v49 = vadd.f32 %v1278_v48, %v1270_v47 }
0x15a5   :  { %2675 = vtanh.f32 %v3050_v49 }
0x15af   :  { %v2676_v51 = vpop.eup %2675 }
0x15b0   :  { %1283 = vrot.lane.b32.xlu1 %v2676_v51, %s2771_s1 }
0x15b4   :  { %100 = vbcast.lane.b32.xlu1 %v98_v52, 256 }
0x1622   :  { %v1284_v53 = vpop.permute.xlu1 %1283 }
0x1623   :  { %v1286_v54 = vmul.f32 %v1284_v53, %v1269_v44  ;;  %v1171_v44 = vadd.f32 %v3043_v34, %v3001_v1 }
0x1625   :  { %1288 = vrot.lane.b32.xlu0 %v1286_v54, %s2772_s20 }
0x1626   :  { %v101_v55 = vpop.permute.xlu1 %100 }
0x1627   :  { %v116_v56 = vmul.f32 %v2865_v14, %v101_v55 }
0x1629   :  { %v131_v57 = vadd.f32 %v2871_v17, %v116_v56 }
0x162b   :  { %v988_v58 = vadd.f32 %v984_v32, %v131_v57 }
0x162d   :  { %v2184_v59 = vmul.f32 -1.442695, %v988_v58 }
0x162f   :  { %2677 = vpow2.f32 %v2184_v59 }
0x1630   :  { %2679 = vtanh.f32 %v988_v58 }
0x1639   :  { %v2678_v60 = vpop.eup %2677 }
0x163a   :  { %v992_v61 = vadd.f32 1.0, %v2678_v60  ;;  %v2680_v63 = vpop.eup %2679 }
0x163c   :  { %2681 = vrcp.f32 %v992_v61 }
0x1646   :  { %v2682_v5 = vpop.eup %2681 }
0x1647   :  { %v996_v11 = vsel %vm44_vm1, %v2682_v5, %v2680_v63  ;;  %v1172_v63 = vadd.f32 %v2999_v0, %v3043_v34 }
0x1648   :  { %999 = vrot.lane.b32.xlu0 %v996_v11, %s2771_s1  ;;  %v997_v10 = vmul.f32 %v996_v11, %v3011_v21 }
0x1697   :  { %v1289_v6 = vpop.permute.xlu0 %1288 }
0x1698   :  { %1291 = vst.msk [vmem:[#allocation3] sm:$0xff] %vm145_vm2, %v1289_v6  ;;  %2431 = vmatmul.mubr.msk.f32.vlgmr.msra.gmra.mrb[10].mxu1 %vm145_vm2, %v1289_v6 }
0x1699   :  { %2575 = vmatpush3.bf16.msra.mxu1 %v3015_v26  ;;  %2452 = vmatprep.mubr.msk.f32.mxu1 %vm2769_vm0, %v2770_v3 }
0x169a   :  { %2576 = vmatprep.subr.bf16.mxu1 %v2768_v2 }
0x169d   :  { %2578 = vmatpush3.bf16.msra.mxu1 %v3019_v9 }
0x169e   :  { %2585 = vmatprep.subr.bf16.mxu1 %v2768_v2 }
0x16ba   :  { %v1000_v14 = vpop.permute.xlu0 %999 }
0x16bb   :  { %v1002_v17 = vmul.f32 %v1000_v14, %v996_v11 }
0x16bd   :  { %1004 = vrot.lane.b32.xlu0 %v1002_v17, %s2771_s1 }
0x172f   :  { %v1005_v12 = vpop.permute.xlu0 %1004 }
0x1730   :  { %v1007_v15 = vadd.f32 %v1005_v12, %v997_v10 }
0x1732   :  { %2683 = vtanh.f32 %v1007_v15 }
0x173c   :  { %v2684_v16 = vpop.eup %2683 }
0x173d   :  { %1010 = vrot.lane.b32.xlu0 %v2684_v16, %s2771_s1 }
0x176b   :  { %v1365_v19 = vpop.f32.mrb[10].mxu1 }
0x176c   :  { %v1369_v20 = vadd.f32 %v1365_v19, %v1170_v18  ;;  %v2432_v22 = vpop.f32.mrb[11].mxu1 }
0x176e   :  { %v2197_v23 = vmul.f32 -1.442695, %v1369_v20 }
0x1770   :  { %2685 = vpow2.f32 %v2197_v23 }
0x1771   :  { %2687 = vtanh.f32 %v1369_v20 }
0x177a   :  { %v2686_v24 = vpop.eup %2685 }
0x177b   :  { %v1373_v27 = vadd.f32 1.0, %v2686_v24  ;;  %v2688_v28 = vpop.eup %2687 }
0x177d   :  { %2689 = vrcp.f32 %v1373_v27 }
0x1787   :  { %v2690_v21 = vpop.eup %2689 }
0x1788   :  { %v1377_v29 = vsel %vm44_vm1, %v2690_v21, %v2688_v28  ;;  %v1173_v21 = vadd.f32 %v3043_v34, %v3005_v8 }
0x1789   :  { %1380 = vrot.lane.b32.xlu1 %v1377_v29, %s2771_s1  ;;  %v1378_v35 = vmul.f32 %v1377_v29, %v3050_v49 }
0x17af   :  { %v1011_v30 = vpop.permute.xlu0 %1010 }
0x17b0   :  { %v1013_v31 = vmul.f32 %v1011_v30, %v996_v11 }
0x17b2   :  { %1015 = vrot.lane.b32.xlu0 %v1013_v31, %s2772_s20 }
0x17fb   :  { %v1381_v62 = vpop.permute.xlu1 %1380 }
0x17fc   :  { %v1383_v13 = vmul.f32 %v1381_v62, %v1377_v29 }
0x17fe   :  { %1385 = vrot.lane.b32.xlu1 %v1383_v13, %s2771_s1 }
0x1824   :  { %v1016_v32 = vpop.permute.xlu0 %1015 }
0x1825   :  { %1019 = vst.msk [vmem:[#allocation3 + $0x38] sm:$0xff] %vm145_vm2, %v1016_v32 }
0x182c   :  { %v1027_v33 = vld [vmem:[#allocation3 + $0x38] sm:$0xff] }
0x182d   :  { %2409 = vmatmul.mubr.msk.f32.gmra.mrb[14].mxu0 %vm145_vm2, %v1027_v33 }
0x182e   :  { %2441 = vmatprep.mubr.msk.f32.mxu0 %vm2769_vm0, %v2770_v3 }
0x1870   :  { %v1386_v36 = vpop.permute.xlu1 %1385 }
0x1871   :  { %v1388_v37 = vadd.f32 %v1386_v36, %v1378_v35 }
0x1873   :  { %2691 = vtanh.f32 %v1388_v37 }
0x187d   :  { %v2692_v38 = vpop.eup %2691 }
0x187e   :  { %1391 = vrot.lane.b32.xlu1 %v2692_v38, %s2771_s1 }
0x18f0   :  { %v1392_v39 = vpop.permute.xlu1 %1391 }
0x18f1   :  { %v1394_v40 = vmul.f32 %v1392_v39, %v1377_v29 }
0x18f3   :  { %1396 = vrot.lane.b32.xlu1 %v1394_v40, %s2772_s20 }
0x1900   :  { %v3087_v41 = vpop.f32.mrb[14].mxu0 }
0x1901   :  { %v3089_v42 = vpop.f32.mrb[15].mxu0 }
0x1965   :  { %v1397_v43 = vpop.permute.xlu1 %1396 }
0x1966   :  { %1399 = vst.msk [vmem:[#allocation3 + $0x8] sm:$0xff] %vm145_vm2, %v1397_v43  ;;  %2442 = vmatmul.mubr.msk.f32.vlgmr.msra.gmra.mrb[16].mxu0 %vm145_vm2, %v1397_v43 }
0x1967   :  { %2581 = vmatpush3.bf16.msra.mxu0 %v3015_v26  ;;  %2463 = vmatprep.mubr.msk.f32.mxu0 %vm2769_vm0, %v2770_v3 }
0x1968   :  { %2582 = vmatprep.subr.bf16.mxu0 %v2768_v2 }
0x196b   :  { %2584 = vmatpush3.bf16.msra.mxu0 %v3019_v9 }
0x196c   :  { %2591 = vmatprep.subr.bf16.mxu0 %v2768_v2 }
0x1a39   :  { %v1473_v45 = vpop.f32.mrb[16].mxu0 }
0x1a3a   :  { %v1477_v46 = vadd.f32 %v1473_v45, %v1171_v44  ;;  %v2443_v47 = vpop.f32.mrb[17].mxu0 }
0x1a3b   :  { %v1174_v47 = vadd.f32 %v3003_v7, %v3043_v34 }
0x1a3c   :  { %v2199_v48 = vmul.f32 -1.442695, %v1477_v46 }
0x1a3e   :  { %2693 = vpow2.f32 %v2199_v48 }
0x1a3f   :  { %2695 = vtanh.f32 %v1477_v46 }
0x1a48   :  { %v2694_v49 = vpop.eup %2693 }
0x1a49   :  { %v1481_v50 = vadd.f32 1.0, %v2694_v49  ;;  %v2696_v51 = vpop.eup %2695 }
0x1a4b   :  { %2697 = vrcp.f32 %v1481_v50 }
0x1a55   :  { %v2698_v52 = vpop.eup %2697 }
0x1a56   :  { %v1485_v53 = vsel %vm44_vm1, %v2698_v52, %v2696_v51 }
0x1a57   :  { %1488 = vrot.lane.b32.xlu0 %v1485_v53, %s2771_s1  ;;  %v1486_v1 = vmul.f32 %v1485_v53, %v1388_v37 }
0x1ac9   :  { %v1489_v54 = vpop.permute.xlu0 %1488 }
0x1aca   :  { %v1491_v55 = vmul.f32 %v1489_v54, %v1485_v53 }
0x1acc   :  { %1493 = vrot.lane.b32.xlu1 %v1491_v55, %s2771_s1 }
0x1b3e   :  { %v1494_v56 = vpop.permute.xlu1 %1493 }
0x1b3f   :  { %v1496_v57 = vadd.f32 %v1494_v56, %v1486_v1 }
0x1b41   :  { %2699 = vtanh.f32 %v1496_v57 }
0x1b4b   :  { %v2700_v58 = vpop.eup %2699 }
0x1b4c   :  { %1499 = vrot.lane.b32.xlu0 %v2700_v58, %s2771_s1 }
0x1bbe   :  { %v1500_v59 = vpop.permute.xlu0 %1499 }
0x1bbf   :  { %v1502_v60 = vmul.f32 %v1500_v59, %v1485_v53 }
0x1bc1   :  { %1504 = vrot.lane.b32.xlu1 %v1502_v60, %s2772_s20  ;;  %v1175_v60 = vadd.f32 %v3043_v34, %v3089_v42 }
0x1c33   :  { %v1505_v61 = vpop.permute.xlu1 %1504 }
0x1c34   :  { %1507 = vst.msk [vmem:[#allocation3 + $0x10] sm:$0xff] %vm145_vm2, %v1505_v61  ;;  %2453 = vmatmul.mubr.msk.f32.vlgmr.msra.gmra.mrb[12].mxu1 %vm145_vm2, %v1505_v61 }
0x1c35   :  { %2587 = vmatpush3.bf16.msra.mxu1 %v3015_v26  ;;  %2474 = vmatprep.mubr.msk.f32.mxu1 %vm2769_vm0, %v2770_v3 }
0x1c36   :  { %2588 = vmatprep.subr.bf16.mxu1 %v2768_v2 }
0x1c39   :  { %2590 = vmatpush3.bf16.msra.mxu1 %v3019_v9 }
0x1c3a   :  { %2597 = vmatprep.subr.bf16.mxu1 %v2768_v2 }
0x1d07   :  { %v1581_v5 = vpop.f32.mrb[12].mxu1 }
0x1d08   :  { %v1585_v11 = vadd.f32 %v1581_v5, %v1172_v63  ;;  %v2454_v6 = vpop.f32.mrb[13].mxu1 }
0x1d0a   :  { %v2201_v14 = vmul.f32 -1.442695, %v1585_v11 }
0x1d0c   :  { %2701 = vpow2.f32 %v2201_v14 }
0x1d0d   :  { %2703 = vtanh.f32 %v1585_v11 }
0x1d16   :  { %v2702_v17 = vpop.eup %2701 }
0x1d17   :  { %v1589_v10 = vadd.f32 1.0, %v2702_v17  ;;  %v2704_v12 = vpop.eup %2703 }
0x1d19   :  { %2705 = vrcp.f32 %v1589_v10 }
0x1d23   :  { %v2706_v15 = vpop.eup %2705 }
0x1d24   :  { %v1593_v16 = vsel %vm44_vm1, %v2706_v15, %v2704_v12 }
0x1d25   :  { %1596 = vrot.lane.b32.xlu0 %v1593_v16, %s2771_s1  ;;  %v1594_v0 = vmul.f32 %v1593_v16, %v1496_v57 }
0x1d97   :  { %v1597_v18 = vpop.permute.xlu0 %1596 }
0x1d98   :  { %v1599_v19 = vmul.f32 %v1597_v18, %v1593_v16 }
0x1d9a   :  { %1601 = vrot.lane.b32.xlu1 %v1599_v19, %s2771_s1 }
0x1e0c   :  { %v1602_v20 = vpop.permute.xlu1 %1601 }
0x1e0d   :  { %v1604_v22 = vadd.f32 %v1602_v20, %v1594_v0 }
0x1e0f   :  { %2707 = vtanh.f32 %v1604_v22 }
0x1e19   :  { %v2708_v23 = vpop.eup %2707 }
0x1e1a   :  { %1607 = vrot.lane.b32.xlu0 %v2708_v23, %s2771_s1 }
0x1e8c   :  { %v1608_v24 = vpop.permute.xlu0 %1607 }
0x1e8d   :  { %v1610_v27 = vmul.f32 %v1608_v24, %v1593_v16  ;;  %v1176_v24 = vadd.f32 %v3087_v41, %v3043_v34 }
0x1e8f   :  { %1612 = vrot.lane.b32.xlu1 %v1610_v27, %s2772_s20 }
0x1f01   :  { %v1613_v28 = vpop.permute.xlu1 %1612 }
0x1f02   :  { %1615 = vst.msk [vmem:[#allocation3 + $0x18] sm:$0xff] %vm145_vm2, %v1613_v28  ;;  %2464 = vmatmul.mubr.msk.f32.vlgmr.msra.gmra.mrb[18].mxu0 %vm145_vm2, %v1613_v28 }
0x1f03   :  { %2593 = vmatpush3.bf16.msra.mxu0 %v3015_v26  ;;  %2485 = vmatprep.mubr.msk.f32.mxu0 %vm2769_vm0, %v2770_v3 }
0x1f04   :  { %2594 = vmatprep.subr.bf16.mxu0 %v2768_v2 }
0x1f07   :  { %2596 = vmatpush3.bf16.msra.mxu0 %v3019_v9 }
0x1fd5   :  { %v1689_v29 = vpop.f32.mrb[18].mxu0 }
0x1fd6   :  { %v1693_v30 = vadd.f32 %v1689_v29, %v1173_v21  ;;  %v2465_v31 = vpop.f32.mrb[19].mxu0 }
0x1fd8   :  { %v2203_v62 = vmul.f32 -1.442695, %v1693_v30 }
0x1fda   :  { %2709 = vpow2.f32 %v2203_v62 }
0x1fdb   :  { %2711 = vtanh.f32 %v1693_v30 }
0x1fe4   :  { %v2710_v13 = vpop.eup %2709 }
0x1fe5   :  { %v1697_v32 = vadd.f32 1.0, %v2710_v13  ;;  %v2712_v33 = vpop.eup %2711 }
0x1fe7   :  { %2713 = vrcp.f32 %v1697_v32 }
0x1ff1   :  { %v2714_v35 = vpop.eup %2713 }
0x1ff2   :  { %v1701_v36 = vsel %vm44_vm1, %v2714_v35, %v2712_v33 }
0x1ff3   :  { %1704 = vrot.lane.b32.xlu0 %v1701_v36, %s2771_s1  ;;  %v1702_v8 = vmul.f32 %v1701_v36, %v1604_v22 }
0x2065   :  { %v1705_v37 = vpop.permute.xlu0 %1704 }
0x2066   :  { %v1707_v38 = vmul.f32 %v1705_v37, %v1701_v36  ;;  %v2095_v37 = vld [vmem:[#allocation4] sm:$0x1] }
0x2067   :  { %2603 = vpush %v2095_v37 }
0x2068   :  { %1709 = vrot.lane.b32.xlu1 %v1707_v38, %s2771_s1 }
0x20da   :  { %v1710_v39 = vpop.permute.xlu1 %1709 }
0x20db   :  { %v1712_v40 = vadd.f32 %v1710_v39, %v1702_v8  ;;  %v2210_v8 = vld [vmem:[%s3195_s5] ss:$0 sm:$0xff]  ;;  %s2604_s5 = spop %2603 }
0x20dc   :  { %v2049_v39 = vld [vmem:[#allocation3] sm:$0xff] }
0x20dd   :  { %2715 = vtanh.f32 %v1712_v40 }
0x20e7   :  { %v2716_v43 = vpop.eup %2715 }
0x20e8   :  { %1715 = vrot.lane.b32.xlu0 %v2716_v43, %s2771_s1  ;;  %v2051_v43 = vld [vmem:[#allocation3 + $0x10] sm:$0xff] }
0x215a   :  { %v1716_v44 = vpop.permute.xlu0 %1715 }
0x215b   :  { %v1718_v45 = vmul.f32 %v1716_v44, %v1701_v36 }
0x215d   :  { %1720 = vrot.lane.b32.xlu1 %v1718_v45, %s2772_s20  ;;  %v2065_v45 = vmul.f32 %v2210_v8, %v2051_v43 }
0x21cf   :  { %v1721_v46 = vpop.permute.xlu1 %1720 }
0x21d0   :  { %1723 = vst.msk [vmem:[#allocation3 + $0x20] sm:$0xff] %vm145_vm2, %v1721_v46  ;;  %2475 = vmatmul.mubr.msk.f32.vlgmr.msra.gmra.mrb[14].mxu1 %vm145_vm2, %v1721_v46  ;;  %v2052_v46 = vld [vmem:[#allocation3 + $0x18] sm:$0xff] }
0x21d1   :  { %2599 = vmatpush3.bf16.msra.mxu1 %v3015_v26  ;;  %2496 = vmatprep.mubr.msk.f32.mxu1 %vm2769_vm0, %v2770_v3 }
0x21d2   :  { %2600 = vmatprep.subr.bf16.mxu1 %v2768_v2 }
0x21d5   :  { %2602 = vmatpush3.bf16.msra.mxu1 %v3019_v9 }
0x22a3   :  { %v1797_v48 = vpop.f32.mrb[14].mxu1 }
0x22a4   :  { %v1801_v49 = vadd.f32 %v1797_v48, %v1174_v47  ;;  %v2476_v50 = vpop.f32.mrb[15].mxu1  ;;  %v2077_v47 = vsel %vm145_vm2, %v2065_v45, 0.0  ;;  %v2066_v48 = vmul.f32 %v2210_v8, %v2052_v46 }
0x22a6   :  { %v2205_v51 = vmul.f32 -1.442695, %v1801_v49  ;;  %v2080_v50 = vsel %vm145_vm2, %v2066_v48, 0.0 }
0x22a8   :  { %2717 = vpow2.f32 %v2205_v51 }
0x22a9   :  { %2719 = vtanh.f32 %v1801_v49 }
0x22b2   :  { %v2718_v52 = vpop.eup %2717 }
0x22b3   :  { %v1805_v53 = vadd.f32 1.0, %v2718_v52  ;;  %v2720_v26 = vpop.eup %2719 }
0x22b5   :  { %2721 = vrcp.f32 %v1805_v53 }
0x22bf   :  { %v2722_v54 = vpop.eup %2721 }
0x22c0   :  { %v1809_v3 = vsel %vm44_vm1, %v2722_v54, %v2720_v26  ;;  %v2050_v54 = vld [vmem:[#allocation3 + $0x8] sm:$0xff] }
0x22c1   :  { %1812 = vrot.lane.b32.xlu0 %v1809_v3, %s2771_s1  ;;  %v1810_v7 = vmul.f32 %v1809_v3, %v1712_v40  ;;  %v2063_v40 = vmul.f32 %v2210_v8, %v2049_v39 }
0x22c3   :  { %v2071_v44 = vsel %vm145_vm2, %v2063_v40, 0.0 }
0x2333   :  { %v1813_v2 = vpop.permute.xlu0 %1812 }
0x2334   :  { %v1815_v9 = vmul.f32 %v1813_v2, %v1809_v3  ;;  %v2053_v2 = vld [vmem:[#allocation3 + $0x20] sm:$0xff] }
0x2336   :  { %1817 = vrot.lane.b32.xlu1 %v1815_v9, %s2771_s1 }
0x23a8   :  { %v1818_v55 = vpop.permute.xlu1 %1817 }
0x23a9   :  { %v1820_v1 = vadd.f32 %v1818_v55, %v1810_v7  ;;  %v2067_v7 = vmul.f32 %v2210_v8, %v2053_v2 }
0x23ab   :  { %2723 = vtanh.f32 %v1820_v1 }
0x23b5   :  { %v2724_v56 = vpop.eup %2723 }
0x23b6   :  { %1823 = vrot.lane.b32.xlu0 %v2724_v56, %s2771_s1 }
0x2428   :  { %v1824_v57 = vpop.permute.xlu0 %1823 }
0x2429   :  { %v1826_v58 = vmul.f32 %v1824_v57, %v1809_v3  ;;  %v2064_v3 = vmul.f32 %v2210_v8, %v2050_v54 }
0x242b   :  { %1828 = vrot.lane.b32.xlu1 %v1826_v58, %s2772_s20  ;;  %v2074_v9 = vsel %vm145_vm2, %v2064_v3, 0.0 }
0x249d   :  { %v1829_v59 = vpop.permute.xlu1 %1828 }
0x249e   :  { %1831 = vst.msk [vmem:[#allocation3 + $0x28] sm:$0xff] %vm145_vm2, %v1829_v59  ;;  %2486 = vmatmul.mubr.msk.f32.vlgmr.msra.gmra.mrb[20].mxu0 %vm145_vm2, %v1829_v59 }
0x24a5   :  { %v2054_v49 = vld [vmem:[#allocation3 + $0x28] sm:$0xff] }
0x24a6   :  { %v2068_v51 = vmul.f32 %v2210_v8, %v2054_v49 }
0x24a8   :  { %v2086_v52 = vsel %vm145_vm2, %v2068_v51, 0.0 }
0x2571   :  { %v1905_v61 = vpop.f32.mrb[20].mxu0 }
0x2572   :  { %v1909_v63 = vadd.f32 %v1905_v61, %v1175_v60  ;;  %v2487_v5 = vpop.f32.mrb[21].mxu0 }
0x2574   :  { %v2207_v11 = vmul.f32 -1.442695, %v1909_v63 }
0x2576   :  { %2725 = vpow2.f32 %v2207_v11  ;;  %v2097_v11 = vstv %s2604_s5 }
0x2577   :  { %2727 = vtanh.f32 %v1909_v63 }
0x2580   :  { %v2726_v6 = vpop.eup %2725 }
0x2581   :  { %v1913_v14 = vadd.f32 1.0, %v2726_v6  ;;  %v2728_v17 = vpop.eup %2727 }
0x2583   :  { %2729 = vrcp.f32 %v1913_v14 }
0x258d   :  { %v2730_v10 = vpop.eup %2729 }
0x258e   :  { %v1917_v12 = vsel %vm44_vm1, %v2730_v10, %v2728_v17  ;;  %v2116_v17 = vsub.s32 %v2874_v25, %v2831_v4 }
0x258f   :  { %1920 = vrot.lane.b32.xlu0 %v1917_v12, %s2771_s1  ;;  %v1918_v42 = vmul.f32 %v1917_v12, %v1820_v1  ;;  %v2083_v1 = vsel %vm145_vm2, %v2067_v7, 0.0 }
0x2601   :  { %v1921_v15 = vpop.permute.xlu0 %1920 }
0x2602   :  { %v1923_v16 = vmul.f32 %v1921_v15, %v1917_v12 }
0x2604   :  { %1925 = vrot.lane.b32.xlu1 %v1923_v16, %s2771_s1 }
0x2676   :  { %v1926_v18 = vpop.permute.xlu1 %1925 }
0x2677   :  { %v1928_v19 = vadd.f32 %v1926_v18, %v1918_v42 }
0x2679   :  { %2731 = vtanh.f32 %v1928_v19 }
0x2683   :  { %v2732_v0 = vpop.eup %2731 }
0x2684   :  { %1931 = vrot.lane.b32.xlu0 %v2732_v0, %s2771_s1 }
0x26f6   :  { %v1932_v20 = vpop.permute.xlu0 %1931 }
0x26f7   :  { %v1934_v22 = vmul.f32 %v1932_v20, %v1917_v12 }
0x26f9   :  { %1936 = vrot.lane.b32.xlu1 %v1934_v22, %s2772_s20 }
0x276b   :  { %v1937_v23 = vpop.permute.xlu1 %1936 }
0x276c   :  { %1939 = vst.msk [vmem:[#allocation3 + $0x30] sm:$0xff] %vm145_vm2, %v1937_v23  ;;  %2497 = vmatmul.mubr.msk.f32.vlgmr.msra.gmra.mrb[16].mxu1 %vm145_vm2, %v1937_v23 }
0x2773   :  { %v2055_v55 = vld [vmem:[#allocation3 + $0x30] sm:$0xff] }
0x2774   :  { %v2069_v56 = vmul.f32 %v2210_v8, %v2055_v55 }
0x2776   :  { %v2089_v57 = vsel %vm145_vm2, %v2069_v56, 0.0 }
0x283f   :  { %v2013_v27 = vpop.f32.mrb[16].mxu1 }
0x2840   :  { %v2017_v28 = vadd.f32 %v2013_v27, %v1176_v24  ;;  %v2498_v21 = vpop.f32.mrb[17].mxu1 }
0x2842   :  { %v2209_v29 = vmul.f32 -1.442695, %v2017_v28 }
0x2844   :  { %2733 = vpow2.f32 %v2209_v29 }
0x2845   :  { %2735 = vtanh.f32 %v2017_v28 }
0x284e   :  { %v2734_v30 = vpop.eup %2733 }
0x284f   :  { %v2021_v31 = vadd.f32 1.0, %v2734_v30  ;;  %v2736_v62 = vpop.eup %2735 }
0x2851   :  { %2737 = vrcp.f32 %v2021_v31 }
0x285b   :  { %v2738_v13 = vpop.eup %2737 }
0x285c   :  { %v2025_v32 = vsel %vm44_vm1, %v2738_v13, %v2736_v62 }
0x285d   :  { %2028 = vrot.lane.b32.xlu0 %v2025_v32, %s2771_s1  ;;  %v2026_v34 = vmul.f32 %v2025_v32, %v1928_v19 }
0x28cf   :  { %v2029_v33 = vpop.permute.xlu0 %2028 }
0x28d0   :  { %v2031_v35 = vmul.f32 %v2029_v33, %v2025_v32 }
0x28d2   :  { %2033 = vrot.lane.b32.xlu1 %v2031_v35, %s2771_s1 }
0x2944   :  { %v2034_v41 = vpop.permute.xlu1 %2033 }
0x2945   :  { %v2036_v36 = vadd.f32 %v2034_v41, %v2026_v34 }
0x2947   :  { %2739 = vtanh.f32 %v2036_v36 }
0x2951   :  { %v2740_v38 = vpop.eup %2739 }
0x2952   :  { %2039 = vrot.lane.b32.xlu0 %v2740_v38, %s2771_s1 }
0x2971   :  { %2072 = vadd.xlane.f32.xlu0 %v2071_v44 }
0x2975   :  { %2078 = vadd.xlane.f32.xlu0 %v2077_v47 }
0x2979   :  { %2081 = vadd.xlane.f32.xlu0 %v2080_v50 }
0x297d   :  { %2087 = vadd.xlane.f32.xlu0 %v2086_v52 }
0x29c4   :  { %v2040_v53 = vpop.permute.xlu0 %2039 }
0x29c5   :  { %v2042_v26 = vmul.f32 %v2040_v53, %v2025_v32 }
0x29c7   :  { %2044 = vrot.lane.b32.xlu1 %v2042_v26, %s2772_s20 }
0x29eb   :  { %2075 = vadd.xlane.f32.xlu1 %v2074_v9 }
0x29ef   :  { %2084 = vadd.xlane.f32.xlu1 %v2083_v1 }
0x29f3   :  { %2090 = vadd.xlane.f32.xlu1 %v2089_v57 }
0x29fe   :  { %v2073_v63 = vpop.xlane.xlu0 %2072 }
0x29ff   :  { %v2098_v10 = vadd.f32 %v2097_v11, %v2073_v63 }
0x2a01   :  { %v2117_v18 = vrot.slane %v2098_v10, %v2116_v17 }
0x2a02   :  { %v2079_v6 = vpop.xlane.xlu0 %2078 }
0x2a03   :  { %v2100_v16 = vadd.f32 %v2097_v11, %v2079_v6 }
0x2a05   :  { %v2125_v20 = vrot.slane %v2100_v16, %v2116_v17 }
0x2a06   :  { %v2082_v42 = vpop.xlane.xlu0 %2081 }
0x2a07   :  { %v2101_v19 = vadd.f32 %v2097_v11, %v2082_v42 }
0x2a09   :  { %v2129_v28 = vrot.slane %v2101_v19, %v2116_v17 }
0x2a0a   :  { %v2088_v24 = vpop.xlane.xlu0 %2087 }
0x2a0b   :  { %v2103_v4 = vadd.f32 %v2097_v11, %v2088_v24 }
0x2a0d   :  { %v2137_v13 = vrot.slane %v2103_v4, %v2116_v17 }
0x2a39   :  { %v2045_v58 = vpop.permute.xlu1 %2044 }
0x2a3a   :  { %2047 = vst.msk [vmem:[#allocation3 + $0x38] sm:$0xff] %vm145_vm2, %v2045_v58 }
0x2a41   :  { %v2056_v59 = vld [vmem:[#allocation3 + $0x38] sm:$0xff] }
0x2a42   :  { %v2070_v60 = vmul.f32 %v2210_v8, %v2056_v59 }
0x2a44   :  { %v2092_v61 = vsel %vm145_vm2, %v2070_v60, 0.0 }
0x2a45   :  { %2093 = vadd.xlane.f32.xlu0 %v2092_v61 }
0x2a78   :  { %v2076_v5 = vpop.xlane.xlu1 %2075 }
0x2a79   :  { %v2099_v14 = vadd.f32 %v2097_v11, %v2076_v5 }
0x2a7b   :  { %v2121_v12 = vrot.slane %v2099_v14, %v2116_v17 }
0x2a7c   :  { %v2085_v15 = vpop.xlane.xlu1 %2084 }
0x2a7d   :  { %v2147_v0 = vsel %vm2146_vm3, %v2121_v12, %v2117_v18  ;;  %v2102_v22 = vadd.f32 %v2097_v11, %v2085_v15 }
0x2a7e   :  { %v2149_v27 = vsel %vm2148_vm4, %v2125_v20, %v2147_v0 }
0x2a7f   :  { %v2133_v21 = vrot.slane %v2102_v22, %v2116_v17  ;;  %v2151_v25 = vsel %vm2150_vm5, %v2129_v28, %v2149_v27 }
0x2a80   :  { %v2091_v23 = vpop.xlane.xlu1 %2090 }
0x2a81   :  { %v2104_v29 = vadd.f32 %v2097_v11, %v2091_v23  ;;  %v2153_v30 = vsel %vm2152_vm6, %v2133_v21, %v2151_v25 }
0x2a82   :  { %v2155_v33 = vsel %vm2154_vm7, %v2137_v13, %v2153_v30 }
0x2a83   :  { %v2141_v31 = vrot.slane %v2104_v29, %v2116_v17 }
0x2a85   :  { %v2157_v34 = vsel %vm2156_vm8, %v2141_v31, %v2155_v33 }
0x2ad2   :  { %v2094_v62 = vpop.xlane.xlu0 %2093 }
0x2ad3   :  { %v2105_v32 = vadd.f32 %v2097_v11, %v2094_v62 }
0x2ad5   :  { %v2145_v35 = vrot.slane %v2105_v32, %v2116_v17 }
0x2ad7   :  { %v2159_v41 = vsel %vm2158_vm9, %v2145_v35, %v2157_v34 }
0x2ad8   :  { %2162 = vst.msk [vmem:[%s3197_s7] sm:$0xff] %vm2161_vm10, %v2159_v41 }
0x2ad9   :  { %2167 = vsyncpa [#allocation6], 1 }

</bundles_post_ra>
